<compile_context>
chip_gen: v5e
topology: v5e:2x2
jax: 0.10.0
libtpu: 0.0.40
codegen_flags: <defaults>
</compile_context>

<pallas_src>
import jax
import jax.numpy as jnp
from jax.experimental import pallas as pl
from jax.experimental.pallas import tpu as pltpu

# ----------------------------- synthetic FLAGS ------------------------------
PROC_SIDE = 16          # FLAGS.proc_side   (input image resolution)
DEPTH = 8               # FLAGS.depth       (heatmap depth bins)
STRIDE_TEST = 4         # FLAGS.stride_test
STRIDE_TRAIN = 4        # FLAGS.stride_train
CENTERED_STRIDE = True  # FLAGS.centered_stride
BOX_SIZE_MM = 2200.0    # FLAGS.box_size_mm
MIX_3D_INSIDE_FOV = 0.5 # FLAGS.mix_3d_inside_fov
N_JOINTS = 8            # joint_info.n_joints  (= n_raw_points here)
C_IN = 4                # image channels
C_FEAT = 32             # synthetic backbone feature channels

HH = PROC_SIDE // STRIDE_TEST       # heatmap height
WW = PROC_SIDE // STRIDE_TEST       # heatmap width
P = HH * WW                         # heatmap pixels per image
C_OUT = N_JOINTS + DEPTH * N_JOINTS # conv_final out channels (sum(n_outs))
OUT_W = 5 * N_JOINTS                # packed output lanes: [x2 y2 x3 y3 z3] * J

BT = 16                             # images per grid step -> BT*P = 256 sublanes

# heatmap_to_image constants (test time)
_LAST_PIX = PROC_SIDE - 1
LRC = float(_LAST_PIX - (_LAST_PIX % STRIDE_TEST))          # last receptive center
OFF = float(STRIDE_TEST // 2) if CENTERED_STRIDE else 0.0   # centered-stride offset
K_MM = BOX_SIZE_MM / PROC_SIDE


# --------------------------- host-side constants -----------------------------
def _heads_constants(bt):
    """Constant tensors passed into the kernel (hoisted out of the grid loop)."""
    f32 = jnp.float32
    J, D = N_JOINTS, DEPTH
    R = bt * P

    r = jnp.arange(R)
    p = r % P
    wx = (p % WW).astype(f32) / max(WW - 1, 1)      # x coord weight of pixel
    wy = (p // WW).astype(f32) / max(HH - 1, 1)     # y coord weight of pixel
    ind = ((r // P)[None, :] == jnp.arange(bt)[:, None]).astype(f32)     # (bt, R)

    # segment-reduction matrix: rows [sum, sum*wx, sum*wy] per batch, one MXU matmul
    red = jnp.concatenate([ind, ind * wx[None, :], ind * wy[None, :]], axis=0)  # (3bt, R)
    expand = jnp.transpose(ind)                                                 # (R, bt)

    # joint selection matrix over (d j) channels and per-channel depth weight
    o = jnp.arange(D * J)
    sel = (o[:, None] % J == jnp.arange(J)[None, :]).astype(f32)                # (D*J, J)
    wz = ((o // J).astype(f32) / max(D - 1, 1))[None, :]                        # (1, D*J)

    # heatmap_to_image / heatmap_to_metric affine folded into one scale/offset FMA
    scale = jnp.concatenate([
        jnp.full((J,), LRC, f32), jnp.full((J,), LRC, f32),
        jnp.full((J,), LRC * K_MM, f32), jnp.full((J,), LRC * K_MM, f32),
        jnp.full((J,), BOX_SIZE_MM, f32)])[None, :]                             # (1, 5J)
    offset = jnp.concatenate([
        jnp.full((J,), OFF, f32), jnp.full((J,), OFF, f32),
        jnp.full((J,), OFF * K_MM, f32), jnp.full((J,), OFF * K_MM, f32),
        jnp.zeros((J,), f32)])[None, :]                                         # (1, 5J)
    return red, expand, sel, wz, scale, offset


# ------------------------------ Pallas kernel -------------------------------
def _make_heads_kernel(bt):
    J, D = N_JOINTS, DEPTH

    def kernel(x_ref, wb_ref, bb_ref, wh_ref, bh_ref,
               red_ref, exp_ref, sel_ref, wz_ref, sc_ref, of_ref, out_ref):
        f32 = jnp.float32
        x = x_ref[...]                                                   # (R, C_IN)

        # synthetic backbone: stride-s 1x1 conv + ReLU  (per-pixel matmul)
        # TODO(synk): bf16 matmul operands (v6e/v5e hint) skipped to keep full f32
        #             fidelity; kernel is overhead/VPU-bound, not MXU-bound.
        feat = jnp.dot(x, wb_ref[...], preferred_element_type=f32) + bb_ref[...]
        feat = jnp.maximum(feat, 0.0)                                    # (R, C_FEAT)

        # MetrabsHeads.conv_final (1x1 conv == channel matmul)
        logits = jnp.dot(feat, wh_ref[...], preferred_element_type=f32) + bh_ref[...]  # (R, C_OUT)

        # ---- per-(batch, joint) softmax stabilizers ----
        lg3d = logits.reshape(bt, P, C_OUT)          # split sublanes: (bt, P, C_OUT)
        m_bc = jnp.max(lg3d, axis=1)                 # (bt, C_OUT)  max over pixels
        m2_bj = m_bc[:, :J]                          # 2D head: per-(b, j) max
        m3_bc = m_bc[:, J:]                          # (bt, D*J), channel = d*J + j
        m3_bj = m3_bc[:, :J]
        for d in range(1, D):                        # per-(b, j) max over depth bins
            m3_bj = jnp.maximum(m3_bj, m3_bc[:, d * J:(d + 1) * J])
        m_all = jnp.concatenate([m2_bj] + [m3_bj] * D, axis=1)           # (bt, C_OUT)

        # broadcast stabilizer back to rows via MXU (avoids sublane broadcasts)
        m_rows = jnp.dot(exp_ref[...], m_all, preferred_element_type=f32)  # (R, C_OUT)
        e = jnp.exp(logits - m_rows)                                       # (R, C_OUT)

        # ---- segment (per-batch) sums as a single MXU matmul ----
        # rows of S: [0:bt]=sum_p, [bt:2bt]=sum_p*wx, [2bt:3bt]=sum_p*wy
        S = jnp.dot(red_ref[...], e, preferred_element_type=f32)          # (3bt, C_OUT)
        S2 = S[:, :J]                                                      # (3bt, J)
        S3 = S[:, J:]                                                      # (3bt, D*J)

        # ---- 2D soft-argmax ----
        den2 = S2[:bt]
        r2 = pl.reciprocal(den2, approx=True)                              # EUP
        r2 = r2 * (2.0 - den2 * r2)                                        # one Newton step
        x2 = S2[bt:2 * bt] * r2
        y2 = S2[2 * bt:] * r2

        # ---- 3D soft-argmax (group channels of each joint via sel matmul) ----
        G3 = jnp.dot(S3, sel_ref[...], preferred_element_type=f32)         # (3bt, J)
        den3 = G3[:bt]
        r3 = pl.reciprocal(den3, approx=True)
        r3 = r3 * (2.0 - den3 * r3)
        x3 = G3[bt:2 * bt] * r3
        y3 = G3[2 * bt:] * r3
        z3 = jnp.dot(S3[:bt] * wz_ref[...], sel_ref[...],
                     preferred_element_type=f32) * r3                      # (bt, J)

        # ---- packed output + fused heatmap_to_image / heatmap_to_metric affine ----
        packed = jnp.concatenate([x2, y2, x3, y3, z3], axis=1)             # (bt, 5J)
        out_ref[...] = packed * sc_ref[...] + of_ref[...]

    return kernel


def metrabs_heads_pallas(x_tokens, wb, bb, wh, bh, bt=BT):
    """x_tokens: (B, P, C_IN). Returns coords2d (B,J,2) [px], coords3d (B,J,3) [mm]."""
    B = x_tokens.shape[0]
    b_pad = -(-B // bt) * bt
    if b_pad != B:
        x_tokens = jnp.pad(x_tokens, ((0, b_pad - B), (0, 0), (0, 0)))
    x_flat = x_tokens.reshape(b_pad * P, C_IN)

    red, expand, sel, wz, scale, offset = _heads_constants(bt)
    R = bt * P

    out = pl.pallas_call(
        _make_heads_kernel(bt),
        out_shape=jax.ShapeDtypeStruct((b_pad, OUT_W), jnp.float32),
        grid_spec=pltpu.PrefetchScalarGridSpec(
            num_scalar_prefetch=0,
            grid=(b_pad // bt,),
            in_specs=[
                pl.BlockSpec((R, C_IN), lambda g: (g, 0)),              # tokens
                pl.BlockSpec((C_IN, C_FEAT), lambda g: (0, 0)),         # wb
                pl.BlockSpec((1, C_FEAT), lambda g: (0, 0)),            # bb
                pl.BlockSpec((C_FEAT, C_OUT), lambda g: (0, 0)),        # wh
                pl.BlockSpec((1, C_OUT), lambda g: (0, 0)),             # bh
                pl.BlockSpec((3 * bt, R), lambda g: (0, 0)),            # red
                pl.BlockSpec((R, bt), lambda g: (0, 0)),                # expand
                pl.BlockSpec((DEPTH * N_JOINTS, N_JOINTS), lambda g: (0, 0)),  # sel
                pl.BlockSpec((1, DEPTH * N_JOINTS), lambda g: (0, 0)),  # wz
                pl.BlockSpec((1, OUT_W), lambda g: (0, 0)),             # scale
                pl.BlockSpec((1, OUT_W), lambda g: (0, 0)),             # offset
            ],
            out_specs=pl.BlockSpec((bt, OUT_W), lambda g: (g, 0)),
        ),
        compiler_params=pltpu.CompilerParams(dimension_semantics=("parallel",)),
    )(x_flat, wb, bb, wh, bh, red, expand, sel, wz, scale, offset)

    out = out[:B]
    J = N_JOINTS
    coords2d = jnp.stack([out[:, 0:J], out[:, J:2 * J]], axis=-1)           # (B, J, 2)
    coords3d = jnp.stack([out[:, 2 * J:3 * J], out[:, 3 * J:4 * J],
                          out[:, 4 * J:5 * J]], axis=-1)                    # (B, J, 3)
    return coords2d, coords3d


# ----------------------- plain-JAX glue (tiny linear algebra) ---------------
def _to_homogeneous(x):
    return jnp.concatenate([x, jnp.ones_like(x[..., :1])], axis=-1)


def _is_within_fov(imcoords, border_factor=0.75):
    lower = STRIDE_TRAIN * border_factor
    upper = PROC_SIDE - STRIDE_TRAIN * border_factor
    return jnp.all((imcoords >= lower) & (imcoords <= upper), axis=-1)


def _reconstruct_ref_fullpersp(normalized_2d, coords3d_rel, validity_mask):
    # TODO(synk): regularized 3x3 lstsq (tf.linalg.lstsq fast path) kept in plain JAX —
    #             per-batch 3x3 normal equations have no useful Pallas tiling.
    B, J, _ = normalized_2d.shape

    def rms_normalize(v):
        scale = jnp.sqrt(jnp.mean(jnp.square(v)))
        return scale, v / scale

    eyes = jnp.tile(jnp.eye(2, dtype=jnp.float32)[None], (B, J, 1))            # (B, 2J, 2)
    scale2d, reshaped2d = rms_normalize(normalized_2d.reshape(B, J * 2, 1))
    vmask = jnp.repeat(validity_mask, 2, axis=1).astype(jnp.float32)[..., None]  # (B, 2J, 1)
    A = jnp.concatenate([eyes, -reshaped2d], axis=2) * vmask                   # (B, 2J, 3)

    rel_backproj = normalized_2d * coords3d_rel[:, :, 2:] - coords3d_rel[:, :, :2]
    scale_rel, b = rms_normalize(rel_backproj.reshape(B, J * 2, 1))
    b = b * vmask

    AtA = jnp.einsum("bni,bnj->bij", A, A) + 1e-2 * jnp.eye(3, dtype=jnp.float32)[None]
    Atb = jnp.einsum("bni,bnk->bik", A, b)
    ref = jnp.linalg.solve(AtA, Atb)                                           # (B, 3, 1)
    ref = jnp.concatenate([ref[:, :2], ref[:, 2:] / scale2d], axis=1) * scale_rel
    return ref[..., 0]                                                         # (B, 3)


def reconstruct_absolute(coords2d, coords3d_rel, intrinsics, mix_3d_inside_fov):
    inv_intrinsics = jnp.linalg.inv(intrinsics)
    coords2d_norm = jnp.einsum("bjk,bik->bji", _to_homogeneous(coords2d), inv_intrinsics)[..., :2]
    in_fov = _is_within_fov(coords2d)                                          # (B, J)
    ref = _reconstruct_ref_fullpersp(coords2d_norm, coords3d_rel, in_fov)      # (B, 3)
    abs_3d_based = coords3d_rel + ref[:, None, :]
    reference_depth = ref[:, 2]
    relative_depths = coords3d_rel[..., 2]
    abs_2d_based = _to_homogeneous(coords2d_norm) * (
        relative_depths + reference_depth[:, None])[..., None]
    if mix_3d_inside_fov is not None:
        abs_2d_based = mix_3d_inside_fov * abs_3d_based + (1 - mix_3d_inside_fov) * abs_2d_based
    return jnp.where(in_fov[..., None], abs_2d_based, abs_3d_based)


def metrabs_forward(image_nchw, intrinsics, params):
    """Metrabs.forward: ((image, intrinsics)) -> coords3d_abs (B, J, 3) in mm."""
    B = image_nchw.shape[0]
    # strided 1x1-conv sampling of the synthetic backbone, NCHW -> (B, P, C_IN)
    xs = image_nchw[:, :, ::STRIDE_TEST, ::STRIDE_TEST]
    x_tokens = jnp.transpose(xs, (0, 2, 3, 1)).reshape(B, P, C_IN)
    coords2d, coords3d = metrabs_heads_pallas(
        x_tokens, params["wb"], params["bb"], params["wh"], params["bh"])
    # TODO(synk): FLAGS.transform_coords / predict_all_and_latents latent remap not
    #             implemented (affine_weights=False path => identity).
    return reconstruct_absolute(coords2d, coords3d, intrinsics, MIX_3D_INSIDE_FOV)


# ------------------------- pure-JAX reference (NCHW) ------------------------
def _soft_argmax_ref(logits, dims):
    m = jnp.max(logits, axis=dims, keepdims=True)
    prob = jnp.exp(logits - m)
    prob = prob / jnp.sum(prob, axis=dims, keepdims=True)
    outs = []
    for d in dims:
        other = tuple(a for a in dims if a != d)
        marg = jnp.sum(prob, axis=other, keepdims=True)
        n = logits.shape[d]
        shape = [1] * logits.ndim
        shape[d] = n
        coords = jnp.linspace(0.0, 1.0, n).reshape(shape)
        outs.append(jnp.sum(marg * coords, axis=dims))
    return jnp.stack(outs, axis=-1)


def metrabs_heads_ref(image_nchw, params):
    B = image_nchw.shape[0]
    xs = image_nchw[:, :, ::STRIDE_TEST, ::STRIDE_TEST]                       # (B, C_IN, HH, WW)
    feat = jnp.einsum("fc,bchw->bfhw", params["wb"].T, xs) + params["bb"][0][:, None, None]
    feat = jnp.maximum(feat, 0.0)
    logits = jnp.einsum("oc,bchw->bohw", params["wh"].T, feat) + params["bh"][0][:, None, None]
    logits2d = logits[:, :N_JOINTS]
    logits3d = logits[:, N_JOINTS:].reshape(B, DEPTH, N_JOINTS, HH, WW)       # b (d j) h w -> b d j h w
    coords3d = _soft_argmax_ref(logits3d, (4, 3, 1))                          # (B, J, 3) [x,y,z]
    coords2d = _soft_argmax_ref(logits2d, (3, 2))                             # (B, J, 2) [x,y]
    c2d_img = coords2d * LRC + OFF
    c3d_xy = (coords3d[..., :2] * LRC + OFF) * BOX_SIZE_MM / PROC_SIDE
    c3d_z = coords3d[..., 2:] * BOX_SIZE_MM
    return c2d_img, jnp.concatenate([c3d_xy, c3d_z], axis=-1)


# ----------------------------------- main ------------------------------------
if __name__ == "__main__":
    key = jax.random.PRNGKey(0)
    k1, k2, k3, k4, k5 = jax.random.split(key, 5)
    params = {
        "wb": jax.random.normal(k1, (C_IN, C_FEAT), jnp.float32) * 0.5,
        "bb": jax.random.normal(k2, (1, C_FEAT), jnp.float32) * 0.1,
        "wh": jax.random.normal(k3, (C_FEAT, C_OUT), jnp.float32) * 0.3,
        "bh": jax.random.normal(k4, (1, C_OUT), jnp.float32) * 0.1,
    }

    B = 32  # 2 grid steps of BT=16 images each (even grid -> both v7x TCs busy)
    image = jax.random.normal(k5, (B, C_IN, PROC_SIDE, PROC_SIDE), jnp.float32)
    focal = 20.0
    intr = jnp.array([[focal, 0.0, PROC_SIDE / 2],
                      [0.0, focal, PROC_SIDE / 2],
                      [0.0, 0.0, 1.0]], jnp.float32)
    intrinsics = jnp.tile(intr[None], (B, 1, 1))

    # kernel heads vs pure-JAX NCHW reference
    xs = image[:, :, ::STRIDE_TEST, ::STRIDE_TEST]
    x_tokens = jnp.transpose(xs, (0, 2, 3, 1)).reshape(B, P, C_IN)
    c2d_k, c3d_k = metrabs_heads_pallas(
        x_tokens, params["wb"], params["bb"], params["wh"], params["bh"])
    c2d_r, c3d_r = metrabs_heads_ref(image, params)
    jax.block_until_ready((c2d_k, c3d_k))
    assert jnp.allclose(c2d_k, c2d_r, rtol=1e-3, atol=1e-2), "2D head mismatch"
    assert jnp.allclose(c3d_k, c3d_r, rtol=1e-3, atol=1e-2), "3D head mismatch"

    # full Metrabs forward
    coords3d_abs = metrabs_forward(image, intrinsics, params)
    coords3d_abs = jax.block_until_ready(coords3d_abs)
    assert coords3d_abs.shape == (B, N_JOINTS, 3)
    assert bool(jnp.all(jnp.isfinite(coords3d_abs)))

    print("KERNEL_OK")
</pallas_src>

<mosaic_0001>
module attributes {stable_mosaic.version = 11 : i64} {
  func.func @kernel(%arg0: i32, %arg1: memref<256x4xf32, #tpu.memory_space<vmem>>, %arg2: memref<4x32xf32, #tpu.memory_space<vmem>>, %arg3: memref<1x32xf32, #tpu.memory_space<vmem>>, %arg4: memref<32x72xf32, #tpu.memory_space<vmem>>, %arg5: memref<1x72xf32, #tpu.memory_space<vmem>>, %arg6: memref<48x256xf32, #tpu.memory_space<vmem>>, %arg7: memref<256x16xf32, #tpu.memory_space<vmem>>, %arg8: memref<64x8xf32, #tpu.memory_space<vmem>>, %arg9: memref<1x64xf32, #tpu.memory_space<vmem>>, %arg10: memref<1x40xf32, #tpu.memory_space<vmem>>, %arg11: memref<1x40xf32, #tpu.memory_space<vmem>>, %arg12: memref<16x40xf32, #tpu.memory_space<vmem>>) attributes {dimension_semantics = [#tpu.dimension_semantics<parallel>], iteration_bounds = array<i64: 2>, scalar_prefetch = 0 : i64, scratch_operands = 0 : i64, tpu.core_type = #tpu.core_type<tc>, window_params = [{transform_indices = @transform_0, window_bounds = array<i64: 256, 4>}, {pipeline_mode = #tpu.pipeline_mode<synchronous>, transform_indices = @transform_1, window_bounds = array<i64: 4, 32>}, {pipeline_mode = #tpu.pipeline_mode<synchronous>, transform_indices = @transform_2, window_bounds = array<i64: 1, 32>}, {pipeline_mode = #tpu.pipeline_mode<synchronous>, transform_indices = @transform_3, window_bounds = array<i64: 32, 72>}, {pipeline_mode = #tpu.pipeline_mode<synchronous>, transform_indices = @transform_4, window_bounds = array<i64: 1, 72>}, {pipeline_mode = #tpu.pipeline_mode<synchronous>, transform_indices = @transform_5, window_bounds = array<i64: 48, 256>}, {pipeline_mode = #tpu.pipeline_mode<synchronous>, transform_indices = @transform_6, window_bounds = array<i64: 256, 16>}, {pipeline_mode = #tpu.pipeline_mode<synchronous>, transform_indices = @transform_7, window_bounds = array<i64: 64, 8>}, {pipeline_mode = #tpu.pipeline_mode<synchronous>, transform_indices = @transform_8, window_bounds = array<i64: 1, 64>}, {pipeline_mode = #tpu.pipeline_mode<synchronous>, transform_indices = @transform_9, window_bounds = array<i64: 1, 40>}, {pipeline_mode = #tpu.pipeline_mode<synchronous>, transform_indices = @transform_10, window_bounds = array<i64: 1, 40>}, {transform_indices = @transform_11, window_bounds = array<i64: 16, 40>}]} {
    %c0 = arith.constant 0 : index
    %c0_0 = arith.constant 0 : index
    %0 = vector.load %arg1[%c0, %c0_0] : memref<256x4xf32, #tpu.memory_space<vmem>>, vector<256x4xf32>
    %c0_1 = arith.constant 0 : index
    %c0_2 = arith.constant 0 : index
    %1 = vector.load %arg2[%c0_1, %c0_2] : memref<4x32xf32, #tpu.memory_space<vmem>>, vector<4x32xf32>
    %cst = arith.constant dense<0.000000e+00> : vector<256x32xf32>
    %2 = tpu.matmul %0, %1, %cst {dimension_numbers = #tpu.dot_dimension_numbers<[1], [0], [0], [1], [0, 0, 1, 1], [], []>} : vector<256x4xf32>, vector<4x32xf32>, vector<256x32xf32> -> vector<256x32xf32>
    %c0_3 = arith.constant 0 : index
    %c0_4 = arith.constant 0 : index
    %3 = vector.load %arg3[%c0_3, %c0_4] : memref<1x32xf32, #tpu.memory_space<vmem>>, vector<1x32xf32>
    %4 = vector.broadcast %3 : vector<1x32xf32> to vector<256x32xf32>
    %5 = arith.addf %2, %4 : vector<256x32xf32>
    %cst_5 = arith.constant 0.000000e+00 : f32
    %6 = vector.broadcast %cst_5 : f32 to vector<256x32xf32>
    %7 = arith.maximumf %5, %6 : vector<256x32xf32>
    %c0_6 = arith.constant 0 : index
    %c0_7 = arith.constant 0 : index
    %8 = vector.load %arg4[%c0_6, %c0_7] : memref<32x72xf32, #tpu.memory_space<vmem>>, vector<32x72xf32>
    %cst_8 = arith.constant dense<0.000000e+00> : vector<256x72xf32>
    %9 = tpu.matmul %7, %8, %cst_8 {dimension_numbers = #tpu.dot_dimension_numbers<[1], [0], [0], [1], [0, 0, 1, 1], [], []>} : vector<256x32xf32>, vector<32x72xf32>, vector<256x72xf32> -> vector<256x72xf32>
    %c0_9 = arith.constant 0 : index
    %c0_10 = arith.constant 0 : index
    %10 = vector.load %arg5[%c0_9, %c0_10] : memref<1x72xf32, #tpu.memory_space<vmem>>, vector<1x72xf32>
    %11 = vector.broadcast %10 : vector<1x72xf32> to vector<256x72xf32>
    %12 = arith.addf %9, %11 : vector<256x72xf32>
    %13 = vector.shape_cast %12 : vector<256x72xf32> to vector<16x16x72xf32>
    %cst_11 = arith.constant dense<0xFF800000> : vector<16x72xf32>
    %14 = vector.multi_reduction <maximumf>, %13, %cst_11 [1] : vector<16x16x72xf32> to vector<16x72xf32>
    %15 = vector.extract_strided_slice %14 {offsets = [0, 0], sizes = [16, 8], strides = [1, 1]} : vector<16x72xf32> to vector<16x8xf32>
    %16 = vector.extract_strided_slice %14 {offsets = [0, 8], sizes = [16, 64], strides = [1, 1]} : vector<16x72xf32> to vector<16x64xf32>
    %17 = vector.extract_strided_slice %16 {offsets = [0, 0], sizes = [16, 8], strides = [1, 1]} : vector<16x64xf32> to vector<16x8xf32>
    %18 = vector.extract_strided_slice %16 {offsets = [0, 8], sizes = [16, 8], strides = [1, 1]} : vector<16x64xf32> to vector<16x8xf32>
    %19 = arith.maximumf %17, %18 : vector<16x8xf32>
    %20 = vector.extract_strided_slice %16 {offsets = [0, 16], sizes = [16, 8], strides = [1, 1]} : vector<16x64xf32> to vector<16x8xf32>
    %21 = arith.maximumf %19, %20 : vector<16x8xf32>
    %22 = vector.extract_strided_slice %16 {offsets = [0, 24], sizes = [16, 8], strides = [1, 1]} : vector<16x64xf32> to vector<16x8xf32>
    %23 = arith.maximumf %21, %22 : vector<16x8xf32>
    %24 = vector.extract_strided_slice %16 {offsets = [0, 32], sizes = [16, 8], strides = [1, 1]} : vector<16x64xf32> to vector<16x8xf32>
    %25 = arith.maximumf %23, %24 : vector<16x8xf32>
    %26 = vector.extract_strided_slice %16 {offsets = [0, 40], sizes = [16, 8], strides = [1, 1]} : vector<16x64xf32> to vector<16x8xf32>
    %27 = arith.maximumf %25, %26 : vector<16x8xf32>
    %28 = vector.extract_strided_slice %16 {offsets = [0, 48], sizes = [16, 8], strides = [1, 1]} : vector<16x64xf32> to vector<16x8xf32>
    %29 = arith.maximumf %27, %28 : vector<16x8xf32>
    %30 = vector.extract_strided_slice %16 {offsets = [0, 56], sizes = [16, 8], strides = [1, 1]} : vector<16x64xf32> to vector<16x8xf32>
    %31 = arith.maximumf %29, %30 : vector<16x8xf32>
    %32 = tpu.concatenate %15, %31, %31, %31, %31, %31, %31, %31, %31 in 1 : vector<16x8xf32>, vector<16x8xf32>, vector<16x8xf32>, vector<16x8xf32>, vector<16x8xf32>, vector<16x8xf32>, vector<16x8xf32>, vector<16x8xf32>, vector<16x8xf32> -> vector<16x72xf32>
    %c0_12 = arith.constant 0 : index
    %c0_13 = arith.constant 0 : index
    %33 = vector.load %arg7[%c0_12, %c0_13] : memref<256x16xf32, #tpu.memory_space<vmem>>, vector<256x16xf32>
    %cst_14 = arith.constant dense<0.000000e+00> : vector<256x72xf32>
    %34 = tpu.matmul %33, %32, %cst_14 {dimension_numbers = #tpu.dot_dimension_numbers<[1], [0], [0], [1], [0, 0, 1, 1], [], []>} : vector<256x16xf32>, vector<16x72xf32>, vector<256x72xf32> -> vector<256x72xf32>
    %35 = arith.subf %12, %34 : vector<256x72xf32>
    %36 = math.exp %35 : vector<256x72xf32>
    %c0_15 = arith.constant 0 : index
    %c0_16 = arith.constant 0 : index
    %37 = vector.load %arg6[%c0_15, %c0_16] : memref<48x256xf32, #tpu.memory_space<vmem>>, vector<48x256xf32>
    %cst_17 = arith.constant dense<0.000000e+00> : vector<48x72xf32>
    %38 = tpu.matmul %37, %36, %cst_17 {dimension_numbers = #tpu.dot_dimension_numbers<[1], [0], [0], [1], [0, 0, 1, 1], [], []>} : vector<48x256xf32>, vector<256x72xf32>, vector<48x72xf32> -> vector<48x72xf32>
    %39 = vector.extract_strided_slice %38 {offsets = [0, 0], sizes = [48, 8], strides = [1, 1]} : vector<48x72xf32> to vector<48x8xf32>
    %40 = vector.extract_strided_slice %38 {offsets = [0, 8], sizes = [48, 64], strides = [1, 1]} : vector<48x72xf32> to vector<48x64xf32>
    %41 = vector.extract_strided_slice %39 {offsets = [0, 0], sizes = [16, 8], strides = [1, 1]} : vector<48x8xf32> to vector<16x8xf32>
    %42 = tpu.reciprocal %41 {approx = true} : vector<16x8xf32> -> vector<16x8xf32>
    %43 = arith.mulf %41, %42 : vector<16x8xf32>
    %cst_18 = arith.constant 2.000000e+00 : f32
    %44 = vector.broadcast %cst_18 : f32 to vector<16x8xf32>
    %45 = arith.subf %44, %43 : vector<16x8xf32>
    %46 = arith.mulf %42, %45 : vector<16x8xf32>
    %47 = vector.extract_strided_slice %39 {offsets = [16, 0], sizes = [16, 8], strides = [1, 1]} : vector<48x8xf32> to vector<16x8xf32>
    %48 = arith.mulf %47, %46 : vector<16x8xf32>
    %49 = vector.extract_strided_slice %39 {offsets = [32, 0], sizes = [16, 8], strides = [1, 1]} : vector<48x8xf32> to vector<16x8xf32>
    %50 = arith.mulf %49, %46 : vector<16x8xf32>
    %c0_19 = arith.constant 0 : index
    %c0_20 = arith.constant 0 : index
    %51 = vector.load %arg8[%c0_19, %c0_20] : memref<64x8xf32, #tpu.memory_space<vmem>>, vector<64x8xf32>
    %cst_21 = arith.constant dense<0.000000e+00> : vector<48x8xf32>
    %52 = tpu.matmul %40, %51, %cst_21 {dimension_numbers = #tpu.dot_dimension_numbers<[1], [0], [0], [1], [0, 0, 1, 1], [], []>} : vector<48x64xf32>, vector<64x8xf32>, vector<48x8xf32> -> vector<48x8xf32>
    %53 = vector.extract_strided_slice %52 {offsets = [0, 0], sizes = [16, 8], strides = [1, 1]} : vector<48x8xf32> to vector<16x8xf32>
    %54 = tpu.reciprocal %53 {approx = true} : vector<16x8xf32> -> vector<16x8xf32>
    %55 = arith.mulf %53, %54 : vector<16x8xf32>
    %cst_22 = arith.constant 2.000000e+00 : f32
    %56 = vector.broadcast %cst_22 : f32 to vector<16x8xf32>
    %57 = arith.subf %56, %55 : vector<16x8xf32>
    %58 = arith.mulf %54, %57 : vector<16x8xf32>
    %59 = vector.extract_strided_slice %52 {offsets = [16, 0], sizes = [16, 8], strides = [1, 1]} : vector<48x8xf32> to vector<16x8xf32>
    %60 = arith.mulf %59, %58 : vector<16x8xf32>
    %61 = vector.extract_strided_slice %52 {offsets = [32, 0], sizes = [16, 8], strides = [1, 1]} : vector<48x8xf32> to vector<16x8xf32>
    %62 = arith.mulf %61, %58 : vector<16x8xf32>
    %63 = vector.extract_strided_slice %40 {offsets = [0, 0], sizes = [16, 64], strides = [1, 1]} : vector<48x64xf32> to vector<16x64xf32>
    %c0_23 = arith.constant 0 : index
    %c0_24 = arith.constant 0 : index
    %64 = vector.load %arg9[%c0_23, %c0_24] : memref<1x64xf32, #tpu.memory_space<vmem>>, vector<1x64xf32>
    %65 = vector.broadcast %64 : vector<1x64xf32> to vector<16x64xf32>
    %66 = arith.mulf %63, %65 : vector<16x64xf32>
    %c0_25 = arith.constant 0 : index
    %c0_26 = arith.constant 0 : index
    %67 = vector.load %arg8[%c0_25, %c0_26] : memref<64x8xf32, #tpu.memory_space<vmem>>, vector<64x8xf32>
    %cst_27 = arith.constant dense<0.000000e+00> : vector<16x8xf32>
    %68 = tpu.matmul %66, %67, %cst_27 {dimension_numbers = #tpu.dot_dimension_numbers<[1], [0], [0], [1], [0, 0, 1, 1], [], []>} : vector<16x64xf32>, vector<64x8xf32>, vector<16x8xf32> -> vector<16x8xf32>
    %69 = arith.mulf %68, %58 : vector<16x8xf32>
    %70 = tpu.concatenate %48, %50, %60, %62, %69 in 1 : vector<16x8xf32>, vector<16x8xf32>, vector<16x8xf32>, vector<16x8xf32>, vector<16x8xf32> -> vector<16x40xf32>
    %c0_28 = arith.constant 0 : index
    %c0_29 = arith.constant 0 : index
    %71 = vector.load %arg10[%c0_28, %c0_29] : memref<1x40xf32, #tpu.memory_space<vmem>>, vector<1x40xf32>
    %72 = vector.broadcast %71 : vector<1x40xf32> to vector<16x40xf32>
    %73 = arith.mulf %70, %72 : vector<16x40xf32>
    %c0_30 = arith.constant 0 : index
    %c0_31 = arith.constant 0 : index
    %74 = vector.load %arg11[%c0_30, %c0_31] : memref<1x40xf32, #tpu.memory_space<vmem>>, vector<1x40xf32>
    %75 = vector.broadcast %74 : vector<1x40xf32> to vector<16x40xf32>
    %76 = arith.addf %73, %75 : vector<16x40xf32>
    %c0_32 = arith.constant 0 : index
    %c0_33 = arith.constant 0 : index
    %77 = vector.load %arg12[%c0_32, %c0_33] : memref<16x40xf32, #tpu.memory_space<vmem>>, vector<16x40xf32>
    tpu.vector_store %arg12[%c0_32, %c0_33], %76 {strides = array<i32>} : memref<16x40xf32, #tpu.memory_space<vmem>>, vector<16x40xf32>,
    return
  }
  func.func @transform_0(%arg0: i32) -> (i32, i32) {
    %c0_i32 = arith.constant 0 : i32
    %c0_i32_0 = arith.constant 0 : i32
    return %arg0, %c0_i32 : i32, i32
  }
  func.func @transform_1(%arg0: i32) -> (i32, i32) {
    %c0_i32 = arith.constant 0 : i32
    %c0_i32_0 = arith.constant 0 : i32
    %c0_i32_1 = arith.constant 0 : i32
    return %c0_i32, %c0_i32_0 : i32, i32
  }
  func.func @transform_2(%arg0: i32) -> (i32, i32) {
    %c0_i32 = arith.constant 0 : i32
    %c0_i32_0 = arith.constant 0 : i32
    %c0_i32_1 = arith.constant 0 : i32
    return %c0_i32, %c0_i32_0 : i32, i32
  }
  func.func @transform_3(%arg0: i32) -> (i32, i32) {
    %c0_i32 = arith.constant 0 : i32
    %c0_i32_0 = arith.constant 0 : i32
    %c0_i32_1 = arith.constant 0 : i32
    return %c0_i32, %c0_i32_0 : i32, i32
  }
  func.func @transform_4(%arg0: i32) -> (i32, i32) {
    %c0_i32 = arith.constant 0 : i32
    %c0_i32_0 = arith.constant 0 : i32
    %c0_i32_1 = arith.constant 0 : i32
    return %c0_i32, %c0_i32_0 : i32, i32
  }
  func.func @transform_5(%arg0: i32) -> (i32, i32) {
    %c0_i32 = arith.constant 0 : i32
    %c0_i32_0 = arith.constant 0 : i32
    %c0_i32_1 = arith.constant 0 : i32
    return %c0_i32, %c0_i32_0 : i32, i32
  }
  func.func @transform_6(%arg0: i32) -> (i32, i32) {
    %c0_i32 = arith.constant 0 : i32
    %c0_i32_0 = arith.constant 0 : i32
    %c0_i32_1 = arith.constant 0 : i32
    return %c0_i32, %c0_i32_0 : i32, i32
  }
  func.func @transform_7(%arg0: i32) -> (i32, i32) {
    %c0_i32 = arith.constant 0 : i32
    %c0_i32_0 = arith.constant 0 : i32
    %c0_i32_1 = arith.constant 0 : i32
    return %c0_i32, %c0_i32_0 : i32, i32
  }
  func.func @transform_8(%arg0: i32) -> (i32, i32) {
    %c0_i32 = arith.constant 0 : i32
    %c0_i32_0 = arith.constant 0 : i32
    %c0_i32_1 = arith.constant 0 : i32
    return %c0_i32, %c0_i32_0 : i32, i32
  }
  func.func @transform_9(%arg0: i32) -> (i32, i32) {
    %c0_i32 = arith.constant 0 : i32
    %c0_i32_0 = arith.constant 0 : i32
    %c0_i32_1 = arith.constant 0 : i32
    return %c0_i32, %c0_i32_0 : i32, i32
  }
  func.func @transform_10(%arg0: i32) -> (i32, i32) {
    %c0_i32 = arith.constant 0 : i32
    %c0_i32_0 = arith.constant 0 : i32
    %c0_i32_1 = arith.constant 0 : i32
    return %c0_i32, %c0_i32_0 : i32, i32
  }
  func.func @transform_11(%arg0: i32) -> (i32, i32) {
    %c0_i32 = arith.constant 0 : i32
    %c0_i32_0 = arith.constant 0 : i32
    return %arg0, %c0_i32 : i32, i32
  }
}

</mosaic_0001>

<bundles_post_ra>
// kernel: tpu_custom_call.1
= control target key start
LH: loop header
LB: loop body
LE: loop exit
PB: predicated region body
PF: predicated region fallthrough
CT: control target
= control target key end

     0   :  { %s4045_s0 = inlined_call_operand.vmem [shape: f32[512,4], index: 0, kind: input, shape index: {}]   ;;  %s4046_s1 = inlined_call_operand.vmem [shape: f32[4,32], index: 1, kind: input, shape index: {}]   ;;  %s4047_s2 = inlined_call_operand.vmem [shape: f32[1,32], index: 2, kind: input, shape index: {}]   ;;  %s4048_s3 = inlined_call_operand.vmem [shape: f32[32,72], index: 3, kind: input, shape index: {}]   ;;  %s4049_s4 = inlined_call_operand.vmem [shape: f32[1,72], index: 4, kind: input, shape index: {}]   ;;  %s4050_s5 = inlined_call_operand.vmem [shape: f32[48,256], index: 5, kind: input, shape index: {}]   ;;  %s4051_s6 = inlined_call_operand.vmem [shape: f32[256,16], index: 6, kind: input, shape index: {}]   ;;  %s4052_s7 = inlined_call_operand.vmem [shape: f32[64,8], index: 7, kind: input, shape index: {}]   ;;  %s4053_s8 = inlined_call_operand.vmem [shape: f32[1,64], index: 8, kind: input, shape index: {}]   ;;  %s4054_s9 = inlined_call_operand.vmem [shape: f32[1,40], index: 9, kind: input, shape index: {}]   ;;  %s4055_s10 = inlined_call_operand.vmem [shape: f32[1,40], index: 10, kind: input, shape index: {}]   ;;  %s4056_s11 = inlined_call_operand.hbm [shape: f32[32,40], index: 11, kind: output, shape index: {}]  }
   0x1   :  { %4092 = sst [smem:[#allocation30_spill]] %s4045_s0 }
   0x2   :  { %4093 = sst [smem:[#allocation31_spill]] %s4046_s1 }
   0x3   :  { %16 = vsyncpa [#allocation3], 0 }
   0x4   :  { %18 = vsyncpa [#allocation3 + $0x1], 0  ;;  %s3026_s17 = smov 0   ;;  %s3028_s18 = smov 0  }
   0x5   :  { %s3030_s19 = smov 0   ;;  %s3032_s20 = smov 0  }
   0x6 LB: > { %s3047_s21 = sadd.s32 4294967295, %s2949_s20   ;;  %s2323_s22 = sadd.s32 4294967294, %s2949_s20   ;;  %s2949_s20 = sphi %s3032_s20, %s4156_s20   ;;  %s2945_s19 = sphi %s3030_s19, %s4155_s19   ;;  %s2941_s18 = sphi %s3028_s18, %s4154_s18   ;;  %s2937_s17 = sphi %s3026_s17, %s4153_s17  }
   0x7   : > { %s3051_s23 = sadd.s32 1, %s2949_s20   ;;  %s267_s24 = sadd.s32 1, %s2945_s19 }
   0x8   : > { %s264_s25 = ssub.s32 %s2949_s20, %s3051_s23  ;;  %p277_p0 = scmp.ne.s32.totalorder %s2945_s19, %s2941_s18 }
   0x9   : > { %p265_p1 = scmp.eq.s32.totalorder %s264_s25, 0  ;;  %p278_p2 = scmp.eq.s32.totalorder %s3047_s21, 1 }
   0xa   : > { %p283_p3 = scmp.ne.s32.totalorder %s2941_s18, %s2937_s17  ;;  %p284_p4 = scmp.eq.s32.totalorder %s2323_s22, 1 }
   0xb   : > { %s3062_s26 = scalar_select %p265_p1, %s2945_s19, %s267_s24  }
   0xc   : > { %p3064_p5 = por %p278_p2, %p277_p0  ;;  %p3068_p6 = por %p284_p4, %p283_p3 }
   0xd   : > { %p2326_p7 = scmp.ge.s32.totalorder %s2949_s20, 1  ;;  %p341_p8 = scmp.lt.s32.totalorder %s2949_s20, 3 }
   0xf   : > { %p342_p9 = pnand %p2326_p7, %p341_p8 }
  0x11   : > { %345 = sbr.rel (%p342_p9) target bundleno = 1821 (0x71d), region = 64 }
  0x16   : > { %s4096_s1 = sld [smem:[#allocation31_spill]]  ;;  %vm522_vm0 = vcmask 1043456   ;;  %s2328_s12 = sshll.u32 %s3047_s21, 5  ;;  %vm425_vm1 = vcmask 31744   ;;  %v674_v13 = vld [vmem:[%s4048_s3 + $0x18] sm:$0xff]  ;;  %v673_v14 = vld [vmem:[%s4048_s3 + $0x10] sm:$0xff] }
  0x17   : > { %p382_p10 = scmp.lt.s32.totalorder %s2328_s12, 63  ;;  %s4097_s0 = sld [smem:[#allocation30_spill]]  ;;  %788 = vmatpush.msra.mxu1 %v674_v13  ;;  %v672_v16 = vld [vmem:[%s4048_s3 + $0x8] sm:$0xff]  ;;  %v671_v17 = vld [vmem:[%s4048_s3] sm:$0xff]  ;;  %vm679_vm2 = vcmask 261120   ;;  %vm889_vm3 = vcmask 588800  }
  0x18   : > { %v3130_v21 = vld [vmem:[%s4047_s2] ss:$0 sm:$0xff]  ;;  %s2951_s25 = smov 104   ;;  %s2952_s29 = smov 112   ;;  %vm1498_vm4 = vcmask 1041409   ;;  %vm1500_vm5 = vcmask 1042434  }
  0x19   : > { %s4158_s12 = smov (!%p382_p10, %s2328_s12), 63  ;;  %789 = vmatpush.msra.mxu1 %v673_v14  ;;  %s4090_s30 = smov 120   ;;  %vm1502_vm6 = vcmask 1043459   ;;  %vm1504_vm7 = vcmask 1044484   ;;  %vm1506_vm8 = vcmask 1045509   ;;  %vm1508_vm9 = vcmask 1046534  }
  0x1a   : > { %s2329_s13 = sshll.u32 %s4158_s12, 3  ;;  %s2954_s12 = smov 88   ;;  %vm1510_vm10 = vcmask 1047559   ;;  %vm1609_vm11 = vcmask 64512   ;;  %vm1612_vm12 = vcmask 130048   ;;  %vm1615_vm13 = vcmask 195584  }
  0x1b   : > { %790 = vmatpush.msra.mxu1 %v672_v16  ;;  %s2956_s14 = smov 80   ;;  %s2957_s15 = smov 72   ;;  %vm1620_vm14 = vcmask 326656   ;;  %vm1623_vm15 = vcmask 392192  }
  0x1c   : > { %v420_v0 = vld [vmem:[%s4096_s1] sm:$0xf]  ;;  %s4084_s22 = smov 24   ;;  %s4088_s24 = smov 8  }
  0x1d   : > { %2330 = vmatpush.msk.msra.mxu0 %vm522_vm0, %v420_v0  ;;  %s3081_s16 = scalar_lea.vmem %s4097_s0, %s2329_s13  ;;  %791 = vmatpush.msra.mxu1 %v671_v17  ;;  %s2955_s13 = smov 96   ;;  %vm1626_vm0 = vcmask 457728  }
  0x1e   : > { %v388_v1 = vld [vmem:[%s3081_s16] sm:$0xff]  ;;  %v389_v2 = vld [vmem:[%s3081_s16 + $0x8] sm:$0xff]  ;;  %v390_v3 = vld [vmem:[%s3081_s16 + $0x10] sm:$0xff]  ;;  %s4150_s0 = smov 16  }
  0x1f   : > { %2331 = vmatmul.msk.f32.vlgmr.msra.gmra.mxu0 %vm425_vm1, %v388_v1  ;;  %v391_v4 = vld [vmem:[%s3081_s16 + $0x18] sm:$0xff]  ;;  %v392_v5 = vld [vmem:[%s3081_s16 + $0x20] sm:$0xff]  ;;  %v393_v6 = vld [vmem:[%s3081_s16 + $0x28] sm:$0xff] }
  0x20   : > { %v394_v7 = vld [vmem:[%s3081_s16 + $0x30] sm:$0xff]  ;;  %v395_v8 = vld [vmem:[%s3081_s16 + $0x38] sm:$0xff]  ;;  %v396_v9 = vld [vmem:[%s3081_s16 + $0x40] sm:$0xff] }
  0x21   : > { %v397_v10 = vld [vmem:[%s3081_s16 + $0x48] sm:$0xff]  ;;  %v398_v11 = vld [vmem:[%s3081_s16 + $0x50] sm:$0xff]  ;;  %v399_v12 = vld [vmem:[%s3081_s16 + $0x58] sm:$0xff] }
  0x22   : > { %v400_v15 = vld [vmem:[%s3081_s16 + $0x60] sm:$0xff]  ;;  %v401_v18 = vld [vmem:[%s3081_s16 + $0x68] sm:$0xff]  ;;  %v402_v19 = vld [vmem:[%s3081_s16 + $0x70] sm:$0xff] }
  0x23   : > { %v403_v20 = vld [vmem:[%s3081_s16 + $0x78] sm:$0xff]  ;;  %v404_v23 = vld [vmem:[%s3081_s16 + $0x80] sm:$0xff]  ;;  %v405_v27 = vld [vmem:[%s3081_s16 + $0x88] sm:$0xff] }
  0x24   : > { %v406_v31 = vld [vmem:[%s3081_s16 + $0x90] sm:$0xff]  ;;  %v407_v35 = vld [vmem:[%s3081_s16 + $0x98] sm:$0xff]  ;;  %v408_v39 = vld [vmem:[%s3081_s16 + $0xa0] sm:$0xff] }
  0x25   : > { %v409_v43 = vld [vmem:[%s3081_s16 + $0xa8] sm:$0xff]  ;;  %v410_v47 = vld [vmem:[%s3081_s16 + $0xb0] sm:$0xff]  ;;  %v411_v51 = vld [vmem:[%s3081_s16 + $0xb8] sm:$0xff] }
  0x26   : > { %v412_v55 = vld [vmem:[%s3081_s16 + $0xc0] sm:$0xff]  ;;  %v413_v59 = vld [vmem:[%s3081_s16 + $0xc8] sm:$0xff]  ;;  %v414_v63 = vld [vmem:[%s3081_s16 + $0xd0] sm:$0xff] }
  0x27   : > { %2332 = vmatmul.msk.f32.gmra.mxu0 %vm425_vm1, %v389_v2 }
  0x2f   : > { %2333 = vmatmul.msk.f32.gmra.mxu0 %vm425_vm1, %v390_v3  ;;  %v415_v3 = vld [vmem:[%s3081_s16 + $0xd8] sm:$0xff] }
  0x37   : > { %2334 = vmatmul.msk.f32.gmra.mxu0 %vm425_vm1, %v391_v4 }
  0x3f   : > { %2335 = vmatmul.msk.f32.gmra.mxu0 %vm425_vm1, %v392_v5 }
  0x47   : > { %2336 = vmatmul.msk.f32.gmra.mxu0 %vm425_vm1, %v393_v6 }
  0x4f   : > { %2337 = vmatmul.msk.f32.gmra.mxu0 %vm425_vm1, %v394_v7  ;;  %v416_v7 = vld [vmem:[%s3081_s16 + $0xe0] sm:$0xff] }
  0x57   : > { %2338 = vmatmul.msk.f32.gmra.mxu0 %vm425_vm1, %v395_v8 }
  0x5f   : > { %2339 = vmatmul.msk.f32.gmra.mxu0 %vm425_vm1, %v396_v9 }
  0x67   : > { %2340 = vmatmul.msk.f32.gmra.mxu0 %vm425_vm1, %v397_v10 }
  0x6f   : > { %2341 = vmatmul.msk.f32.gmra.mxu0 %vm425_vm1, %v398_v11  ;;  %v417_v11 = vld [vmem:[%s3081_s16 + $0xe8] sm:$0xff] }
  0x77   : > { %2342 = vmatmul.msk.f32.gmra.mxu0 %vm425_vm1, %v399_v12 }
  0x7f   : > { %2343 = vmatmul.msk.f32.gmra.mxu0 %vm425_vm1, %v400_v15  ;;  %v418_v15 = vld [vmem:[%s3081_s16 + $0xf0] sm:$0xff] }
  0x87   : > { %2344 = vmatmul.msk.f32.gmra.mxu0 %vm425_vm1, %v401_v18 }
  0x8f   : > { %2345 = vmatmul.msk.f32.gmra.mxu0 %vm425_vm1, %v402_v19  ;;  %v419_v19 = vld [vmem:[%s3081_s16 + $0xf8] sm:$0xff]  ;;  %s4086_s16 = smov 16  }
  0x97   : > { %2346 = vmatmul.msk.f32.gmra.mxu0 %vm425_vm1, %v403_v20 }
  0x9c   : > { %v543_v22 = vpop.f32.mrf.mxu0 }
  0x9d   : > { %v544_v24 = vadd.f32 %v3130_v21, %v543_v22 }
  0x9f   : > { %v639_v25 = vmax.f32 %v544_v24, 0.0  ;;  %2347 = vmatmul.msk.f32.gmra.mxu0 %vm425_vm1, %v404_v23 }
  0xa1   : > { %2363 = vmatmul.msk.f32.vlgmr.msra.gmra.mxu1 %vm679_vm2, %v639_v25 }
  0xa4   : > { %v546_v26 = vpop.f32.mrf.mxu0 }
  0xa5   : > { %v547_v28 = vadd.f32 %v3130_v21, %v546_v26 }
  0xa7   : > { %v640_v29 = vmax.f32 %v547_v28, 0.0  ;;  %2348 = vmatmul.msk.f32.gmra.mxu0 %vm425_vm1, %v405_v27 }
  0xa9   : > { %2364 = vmatmul.msk.f32.gmra.mxu1 %vm679_vm2, %v640_v29 }
  0xac   : > { %v549_v30 = vpop.f32.mrf.mxu0 }
  0xad   : > { %v550_v32 = vadd.f32 %v3130_v21, %v549_v30 }
  0xaf   : > { %v641_v33 = vmax.f32 %v550_v32, 0.0  ;;  %2349 = vmatmul.msk.f32.gmra.mxu0 %vm425_vm1, %v406_v31 }
  0xb1   : > { %2365 = vmatmul.msk.f32.gmra.mxu1 %vm679_vm2, %v641_v33 }
  0xb4   : > { %v552_v34 = vpop.f32.mrf.mxu0 }
  0xb5   : > { %v553_v36 = vadd.f32 %v3130_v21, %v552_v34 }
  0xb7   : > { %v642_v37 = vmax.f32 %v553_v36, 0.0  ;;  %2350 = vmatmul.msk.f32.gmra.mxu0 %vm425_vm1, %v407_v35 }
  0xb9   : > { %2366 = vmatmul.msk.f32.gmra.mxu1 %vm679_vm2, %v642_v37 }
  0xbc   : > { %v555_v38 = vpop.f32.mrf.mxu0 }
  0xbd   : > { %v556_v40 = vadd.f32 %v3130_v21, %v555_v38 }
  0xbf   : > { %v643_v41 = vmax.f32 %v556_v40, 0.0  ;;  %2351 = vmatmul.msk.f32.gmra.mxu0 %vm425_vm1, %v408_v39 }
  0xc1   : > { %2367 = vmatmul.msk.f32.gmra.mxu1 %vm679_vm2, %v643_v41 }
  0xc4   : > { %v558_v42 = vpop.f32.mrf.mxu0 }
  0xc5   : > { %v559_v44 = vadd.f32 %v3130_v21, %v558_v42 }
  0xc7   : > { %v644_v45 = vmax.f32 %v559_v44, 0.0  ;;  %2352 = vmatmul.msk.f32.gmra.mxu0 %vm425_vm1, %v409_v43 }
  0xc9   : > { %2368 = vmatmul.msk.f32.gmra.mxu1 %vm679_vm2, %v644_v45 }
  0xcc   : > { %v561_v46 = vpop.f32.mrf.mxu0 }
  0xcd   : > { %v562_v48 = vadd.f32 %v3130_v21, %v561_v46 }
  0xcf   : > { %v645_v49 = vmax.f32 %v562_v48, 0.0  ;;  %2353 = vmatmul.msk.f32.gmra.mxu0 %vm425_vm1, %v410_v47 }
  0xd1   : > { %2369 = vmatmul.msk.f32.gmra.mxu1 %vm679_vm2, %v645_v49 }
  0xd4   : > { %v564_v50 = vpop.f32.mrf.mxu0 }
  0xd5   : > { %v565_v52 = vadd.f32 %v3130_v21, %v564_v50 }
  0xd7   : > { %v646_v53 = vmax.f32 %v565_v52, 0.0  ;;  %2354 = vmatmul.msk.f32.gmra.mxu0 %vm425_vm1, %v411_v51 }
  0xd9   : > { %2370 = vmatmul.msk.f32.gmra.mxu1 %vm679_vm2, %v646_v53 }
  0xdc   : > { %v567_v54 = vpop.f32.mrf.mxu0 }
  0xdd   : > { %v568_v56 = vadd.f32 %v3130_v21, %v567_v54 }
  0xdf   : > { %v647_v57 = vmax.f32 %v568_v56, 0.0  ;;  %2355 = vmatmul.msk.f32.gmra.mxu0 %vm425_vm1, %v412_v55 }
  0xe1   : > { %2371 = vmatmul.msk.f32.gmra.mxu1 %vm679_vm2, %v647_v57 }
  0xe4   : > { %v570_v58 = vpop.f32.mrf.mxu0 }
  0xe5   : > { %v571_v60 = vadd.f32 %v3130_v21, %v570_v58 }
  0xe7   : > { %v648_v61 = vmax.f32 %v571_v60, 0.0  ;;  %2356 = vmatmul.msk.f32.gmra.mxu0 %vm425_vm1, %v413_v59 }
  0xe9   : > { %2372 = vmatmul.msk.f32.gmra.mxu1 %vm679_vm2, %v648_v61 }
  0xec   : > { %v573_v62 = vpop.f32.mrf.mxu0 }
  0xed   : > { %v574_v0 = vadd.f32 %v3130_v21, %v573_v62 }
  0xef   : > { %v649_v1 = vmax.f32 %v574_v0, 0.0  ;;  %2357 = vmatmul.msk.f32.gmra.mxu0 %vm425_vm1, %v414_v63 }
  0xf1   : > { %2373 = vmatmul.msk.f32.gmra.mxu1 %vm679_vm2, %v649_v1 }
  0xf4   : > { %v576_v2 = vpop.f32.mrf.mxu0 }
  0xf5   : > { %v577_v4 = vadd.f32 %v3130_v21, %v576_v2 }
  0xf7   : > { %v650_v5 = vmax.f32 %v577_v4, 0.0  ;;  %2358 = vmatmul.msk.f32.gmra.mxu0 %vm425_vm1, %v415_v3 }
  0xf9   : > { %2374 = vmatmul.msk.f32.gmra.mxu1 %vm679_vm2, %v650_v5 }
  0xfc   : > { %v579_v6 = vpop.f32.mrf.mxu0 }
  0xfd   : > { %v580_v8 = vadd.f32 %v3130_v21, %v579_v6 }
  0xff   : > { %v651_v9 = vmax.f32 %v580_v8, 0.0  ;;  %2359 = vmatmul.msk.f32.gmra.mxu0 %vm425_vm1, %v416_v7 }
 0x101   : > { %2375 = vmatmul.msk.f32.gmra.mxu1 %vm679_vm2, %v651_v9 }
 0x104   : > { %v582_v10 = vpop.f32.mrf.mxu0 }
 0x105   : > { %v583_v12 = vadd.f32 %v3130_v21, %v582_v10 }
 0x107   : > { %v652_v13 = vmax.f32 %v583_v12, 0.0  ;;  %2360 = vmatmul.msk.f32.gmra.mxu0 %vm425_vm1, %v417_v11  ;;  %v3249_v12 = vld [vmem:[%s4049_s4] ss:$0 sm:$0xff] }
 0x109   : > { %2376 = vmatmul.msk.f32.gmra.mxu1 %vm679_vm2, %v652_v13 }
 0x10c   : > { %v585_v14 = vpop.f32.mrf.mxu0 }
 0x10d   : > { %v586_v16 = vadd.f32 %v3130_v21, %v585_v14 }
 0x10f   : > { %v653_v17 = vmax.f32 %v586_v16, 0.0  ;;  %2361 = vmatmul.msk.f32.gmra.mxu0 %vm425_vm1, %v418_v15 }
 0x111   : > { %2377 = vmatmul.msk.f32.gmra.mxu1 %vm679_vm2, %v653_v17 }
 0x114   : > { %v588_v18 = vpop.f32.mrf.mxu0 }
 0x115   : > { %v589_v20 = vadd.f32 %v3130_v21, %v588_v18 }
 0x117   : > { %v654_v22 = vmax.f32 %v589_v20, 0.0  ;;  %2362 = vmatmul.msk.f32.gmra.mxu0 %vm425_vm1, %v419_v19  ;;  %vm1629_vm1 = vcmask 523264  }
 0x119   : > { %2378 = vmatmul.msk.f32.gmra.mxu1 %vm679_vm2, %v654_v22 }
 0x11c   : > { %v591_v23 = vpop.f32.mrf.mxu0 }
 0x11d   : > { %v592_v24 = vadd.f32 %v3130_v21, %v591_v23 }
 0x11e   : > { %v3197_v25 = vpop.f32.mrf.mxu1 }
 0x11f   : > { %v655_v26 = vmax.f32 %v592_v24, 0.0 }
 0x121   : > { %2379 = vmatmul.msk.f32.gmra.mxu1 %vm679_vm2, %v655_v26 }
 0x124   : > { %v594_v27 = vpop.f32.mrf.mxu0 }
 0x125   : > { %v595_v28 = vadd.f32 %v3130_v21, %v594_v27 }
 0x126   : > { %v3201_v29 = vpop.f32.mrf.mxu1 }
 0x127   : > { %v656_v30 = vmax.f32 %v595_v28, 0.0 }
 0x129   : > { %2380 = vmatmul.msk.f32.gmra.mxu1 %vm679_vm2, %v656_v30 }
 0x12c   : > { %v597_v31 = vpop.f32.mrf.mxu0 }
 0x12d   : > { %v598_v32 = vadd.f32 %v3130_v21, %v597_v31 }
 0x12e   : > { %v3205_v33 = vpop.f32.mrf.mxu1 }
 0x12f   : > { %v657_v34 = vmax.f32 %v598_v32, 0.0 }
 0x131   : > { %2381 = vmatmul.msk.f32.gmra.mxu1 %vm679_vm2, %v657_v34 }
 0x134   : > { %v600_v35 = vpop.f32.mrf.mxu0 }
 0x135   : > { %v601_v36 = vadd.f32 %v3130_v21, %v600_v35 }
 0x136   : > { %v3209_v37 = vpop.f32.mrf.mxu1 }
 0x137   : > { %v658_v38 = vmax.f32 %v601_v36, 0.0  ;;  %v3271_v35 = vadd.f32 %v3249_v12, %v3209_v37 }
 0x139   : > { %2382 = vmatmul.msk.f32.gmra.mxu1 %vm679_vm2, %v658_v38  ;;  %4098 = vst [vmem:[#allocation5_spill] sm:$0xff] %v3271_v35  ;;  %v900_v37 = vsel %vm889_vm3, %v3271_v35, -inf }
 0x13c   : > { %v603_v39 = vpop.f32.mrf.mxu0 }
 0x13d   : > { %v604_v40 = vadd.f32 %v3130_v21, %v603_v39  ;;  %v3278_v39 = vadd.f32 %v3249_v12, %v3205_v33 }
 0x13e   : > { %v3213_v41 = vpop.f32.mrf.mxu1 }
 0x13f   : > { %v659_v42 = vmax.f32 %v604_v40, 0.0  ;;  %4099 = vst [vmem:[#allocation6_spill] sm:$0xff] %v3278_v39 }
 0x141   : > { %2383 = vmatmul.msk.f32.gmra.mxu1 %vm679_vm2, %v659_v42 }
 0x144   : > { %v606_v43 = vpop.f32.mrf.mxu0 }
 0x145   : > { %v607_v44 = vadd.f32 %v3130_v21, %v606_v43 }
 0x146   : > { %v3217_v45 = vpop.f32.mrf.mxu1 }
 0x147   : > { %v660_v46 = vmax.f32 %v607_v44, 0.0 }
 0x149   : > { %2384 = vmatmul.msk.f32.gmra.mxu1 %vm679_vm2, %v660_v46  ;;  %v899_v46 = vsel %vm889_vm3, %v3278_v39, -inf }
 0x14c   : > { %v609_v47 = vpop.f32.mrf.mxu0 }
 0x14d   : > { %v610_v48 = vadd.f32 %v3130_v21, %v609_v47  ;;  %v901_v47 = vmax.f32 %v899_v46, %v900_v37  ;;  %v3351_v37 = vadd.f32 %v3249_v12, %v3213_v41 }
 0x14e   : > { %v3221_v49 = vpop.f32.mrf.mxu1 }
 0x14f   : > { %v661_v50 = vmax.f32 %v610_v48, 0.0  ;;  %4107 = vst [vmem:[#allocation14_spill] sm:$0xff] %v3351_v37  ;;  %v908_v41 = vsel %vm889_vm3, %v3351_v37, -inf }
 0x151   : > { %2385 = vmatmul.msk.f32.gmra.mxu1 %vm679_vm2, %v661_v50 }
 0x154   : > { %v612_v51 = vpop.f32.mrf.mxu0 }
 0x155   : > { %v613_v52 = vadd.f32 %v3130_v21, %v612_v51 }
 0x156   : > { %v3225_v53 = vpop.f32.mrf.mxu1 }
 0x157   : > { %v662_v54 = vmax.f32 %v613_v52, 0.0  ;;  %v902_v52 = vrot.slane %v901_v47, 4 }
 0x159   : > { %2386 = vmatmul.msk.f32.gmra.mxu1 %vm679_vm2, %v662_v54 }
 0x15c   : > { %v615_v55 = vpop.f32.mrf.mxu0 }
 0x15d   : > { %v616_v56 = vadd.f32 %v3130_v21, %v615_v55 }
 0x15e   : > { %v3229_v57 = vpop.f32.mrf.mxu1 }
 0x15f   : > { %v663_v58 = vmax.f32 %v616_v56, 0.0 }
 0x161   : > { %2387 = vmatmul.msk.f32.gmra.mxu1 %vm679_vm2, %v663_v58 }
 0x164   : > { %v618_v59 = vpop.f32.mrf.mxu0 }
 0x165   : > { %v619_v60 = vadd.f32 %v3130_v21, %v618_v59  ;;  %v903_v59 = vmax.f32 %v901_v47, %v902_v52 }
 0x166   : > { %v3233_v61 = vpop.f32.mrf.mxu1 }
 0x167   : > { %v664_v62 = vmax.f32 %v619_v60, 0.0 }
 0x169   : > { %2388 = vmatmul.msk.f32.gmra.mxu1 %vm679_vm2, %v664_v62 }
 0x16c   : > { %v621_v63 = vpop.f32.mrf.mxu0 }
 0x16d   : > { %v622_v0 = vadd.f32 %v3130_v21, %v621_v63 }
 0x16e   : > { %v3237_v1 = vpop.f32.mrf.mxu1 }
 0x16f   : > { %v665_v2 = vmax.f32 %v622_v0, 0.0 }
 0x171   : > { %2389 = vmatmul.msk.f32.gmra.mxu1 %vm679_vm2, %v665_v2 }
 0x174   : > { %v624_v3 = vpop.f32.mrf.mxu0 }
 0x175   : > { %v625_v4 = vadd.f32 %v3130_v21, %v624_v3 }
 0x176   : > { %v3241_v5 = vpop.f32.mrf.mxu1 }
 0x177   : > { %v666_v6 = vmax.f32 %v625_v4, 0.0 }
 0x179   : > { %2390 = vmatmul.msk.f32.gmra.mxu1 %vm679_vm2, %v666_v6  ;;  %v904_v6 = vrot.slane %v903_v59, 2 }
 0x17c   : > { %v627_v7 = vpop.f32.mrf.mxu0 }
 0x17d   : > { %v628_v8 = vadd.f32 %v3130_v21, %v627_v7 }
 0x17e   : > { %v829_v9 = vpop.f32.mrf.mxu1 }
 0x17f   : > { %v667_v10 = vmax.f32 %v628_v8, 0.0  ;;  %v3256_v17 = vadd.f32 %v3249_v12, %v829_v9  ;;  %v905_v9 = vmax.f32 %v903_v59, %v904_v6 }
 0x181   : > { %2391 = vmatmul.msk.f32.gmra.mxu1 %vm679_vm2, %v667_v10  ;;  %v944_v20 = vsel %vm889_vm3, %v3256_v17, -inf }
 0x184   : > { %v630_v11 = vpop.f32.mrf.mxu0 }
 0x185   : > { %v631_v13 = vadd.f32 %v3130_v21, %v630_v11 }
 0x186   : > { %v832_v14 = vpop.f32.mrf.mxu1 }
 0x187   : > { %v668_v15 = vmax.f32 %v631_v13, 0.0  ;;  %v3253_v16 = vadd.f32 %v3249_v12, %v832_v14  ;;  %v906_v14 = vrot.slane %v905_v9, 1 }
 0x189   : > { %2392 = vmatmul.msk.f32.gmra.mxu1 %vm679_vm2, %v668_v15  ;;  %v945_v18 = vsel %vm889_vm3, %v3253_v16, -inf }
 0x18a   : > { %v946_v23 = vmax.f32 %v944_v20, %v945_v18 }
 0x18c   : > { %v633_v19 = vpop.f32.mrf.mxu0  ;;  %v947_v27 = vrot.slane %v946_v23, 4 }
 0x18d   : > { %v634_v22 = vadd.f32 %v3130_v21, %v633_v19  ;;  %v3317_v19 = vmax.f32 %v905_v9, %v906_v14  ;;  %v3382_v14 = vadd.f32 %v3249_v12, %v3197_v25 }
 0x18e   : > { %v835_v24 = vpop.f32.mrf.mxu1  ;;  %v948_v32 = vmax.f32 %v946_v23, %v947_v27 }
 0x18f   : > { %v669_v26 = vmax.f32 %v634_v22, 0.0  ;;  %v3266_v30 = vadd.f32 %v3249_v12, %v835_v24  ;;  %4111 = vst [vmem:[#allocation18_spill] sm:$0xff] %v3382_v14  ;;  %v890_v25 = vsel %vm889_vm3, %v3382_v14, -inf }
 0x190   : > { %v949_v42 = vrot.slane %v948_v32, 2 }
 0x191   : > { %2393 = vmatmul.msk.f32.gmra.mxu1 %vm679_vm2, %v669_v26  ;;  %v953_v40 = vsel %vm889_vm3, %v3266_v30, -inf }
 0x192   : > { %v950_v33 = vmax.f32 %v948_v32, %v949_v42  ;;  %v3344_v42 = vadd.f32 %v3249_v12, %v3217_v45 }
 0x194   : > { %v636_v28 = vpop.f32.mrf.mxu0  ;;  %v951_v54 = vrot.slane %v950_v33, 1  ;;  %4105 = vst [vmem:[#allocation12_spill] sm:$0xff] %v3344_v42  ;;  %v909_v45 = vsel %vm889_vm3, %v3344_v42, -inf }
 0x195   : > { %v637_v31 = vadd.f32 %v3130_v21, %v636_v28 }
 0x196   : > { %v838_v34 = vpop.f32.mrf.mxu1  ;;  %v3292_v60 = vmax.f32 %v950_v33, %v951_v54 }
 0x197   : > { %v670_v36 = vmax.f32 %v637_v31, 0.0  ;;  %v3274_v38 = vadd.f32 %v3249_v12, %v838_v34 }
 0x199   : > { %v954_v21 = vsel %vm889_vm3, %v3274_v38, -inf  ;;  %2394 = vmatmul.msk.f32.gmra.mxu1 %vm679_vm2, %v670_v36 }
 0x19a   : > { %v955_v43 = vmax.f32 %v953_v40, %v954_v21 }
 0x19c   : > { %v956_v44 = vrot.slane %v955_v43, 4 }
 0x19e   : > { %v957_v48 = vmax.f32 %v955_v43, %v956_v44  ;;  %v841_v50 = vpop.f32.mrf.mxu1 }
 0x19f   : > { %v3290_v58 = vadd.f32 %v3249_v12, %v841_v50  ;;  %v910_v50 = vmax.f32 %v908_v41, %v909_v45 }
 0x1a0   : > { %v958_v51 = vrot.slane %v957_v48, 2 }
 0x1a1   : > { %4100 = vst [vmem:[#allocation7_spill] sm:$0xff] %v3290_v58  ;;  %v962_v3 = vsel %vm889_vm3, %v3290_v58, -inf }
 0x1a2   : > { %v959_v55 = vmax.f32 %v957_v48, %v958_v51 }
 0x1a4   : > { %v960_v56 = vrot.slane %v959_v55, 1 }
 0x1a6   : > { %v3294_v62 = vmax.f32 %v959_v55, %v960_v56  ;;  %v844_v63 = vpop.f32.mrf.mxu1  ;;  %v911_v56 = vrot.slane %v910_v50, 4 }
 0x1a7   : > { %v3297_v0 = vadd.f32 %v3249_v12, %v844_v63 }
 0x1a8   : > { %v3301_v2 = vpack.i.bf16 %v3294_v62, %v3292_v60  ;;  %v912_v6 = vmax.f32 %v910_v50, %v911_v56 }
 0x1a9   : > { %4101 = vst [vmem:[#allocation8_spill] sm:$0xff] %v3297_v0  ;;  %v963_v4 = vsel %vm889_vm3, %v3297_v0, -inf }
 0x1aa   : > { %v964_v7 = vmax.f32 %v962_v3, %v963_v4  ;;  %2506 = vrot.lane.b32.xlu2 %v3301_v2, %s2951_s25  ;;  %2501 = vrot.lane.b32.xlu0 %v3301_v2, %s2952_s29 }
 0x1ab   : > { %2496 = vrot.lane.b32.xlu1 %v3301_v2, %s4090_s30 }
 0x1ac   : > { %v965_v8 = vrot.slane %v964_v7, 4 }
 0x1ae   : > { %v966_v10 = vmax.f32 %v964_v7, %v965_v8  ;;  %v847_v11 = vpop.f32.mrf.mxu1 }
 0x1af   : > { %v3327_v26 = vadd.f32 %v3249_v12, %v847_v11 }
 0x1b0   : > { %v967_v13 = vrot.slane %v966_v10, 2 }
 0x1b1   : > { %4103 = vst [vmem:[#allocation10_spill] sm:$0xff] %v3327_v26  ;;  %v971_v28 = vsel %vm889_vm3, %v3327_v26, -inf }
 0x1b2   : > { %v968_v15 = vmax.f32 %v966_v10, %v967_v13  ;;  %2516 = vrot.lane.b32.xlu2 %v3301_v2, %s2954_s12  ;;  %v3373_v10 = vadd.f32 %v3249_v12, %v3201_v29 }
 0x1b3   : > { %2511 = vrot.lane.b32.xlu1 %v3301_v2, %s2955_s13 }
 0x1b4   : > { %v969_v18 = vrot.slane %v968_v15, 1  ;;  %4109 = vst [vmem:[#allocation16_spill] sm:$0xff] %v3373_v10  ;;  %v891_v29 = vsel %vm889_vm3, %v3373_v10, -inf }
 0x1b6   : > { %v3319_v20 = vmax.f32 %v968_v15, %v969_v18  ;;  %v850_v22 = vpop.f32.mrf.mxu1 }
 0x1b7   : > { %v3322_v23 = vadd.f32 %v3249_v12, %v850_v22  ;;  %v913_v22 = vrot.slane %v912_v6, 2 }
 0x1b8   : > { %v2545_v24 = vpack.i.bf16 %v3319_v20, %v3317_v19 }
 0x1b9   : > { %4102 = vst [vmem:[#allocation9_spill] sm:$0xff] %v3322_v23  ;;  %v972_v27 = vsel %vm889_vm3, %v3322_v23, -inf }
 0x1ba   : > { %2546 = vrot.lane.b32.xlu2 %v2545_v24, %s2954_s12  ;;  %2526 = vrot.lane.b32.xlu0 %v2545_v24, %s4090_s30  ;;  %v973_v31 = vmax.f32 %v971_v28, %v972_v27  ;;  %v892_v28 = vmax.f32 %v890_v25, %v891_v29 }
 0x1bb   : > { %2521 = vrot.lane.b32.xlu1 %v3301_v2, %s2956_s14 }
 0x1bc   : > { %v974_v34 = vrot.slane %v973_v31, 4 }
 0x1be   : > { %v853_v32 = vpop.f32.mrf.mxu1  ;;  %v975_v40 = vmax.f32 %v973_v31, %v974_v34  ;;  %v914_v31 = vmax.f32 %v912_v6, %v913_v22 }
 0x1bf   : > { %v3340_v36 = vadd.f32 %v3249_v12, %v853_v32 }
 0x1c0   : > { %v976_v47 = vrot.slane %v975_v40, 2 }
 0x1c1   : > { %4104 = vst [vmem:[#allocation11_spill] sm:$0xff] %v3340_v36  ;;  %v980_v44 = vsel %vm889_vm3, %v3340_v36, -inf }
 0x1c2   : > { %2531 = vrot.lane.b32.xlu0 %v2545_v24, %s2952_s29  ;;  %v977_v51 = vmax.f32 %v975_v40, %v976_v47 }
 0x1c3   : > { %2536 = vrot.lane.b32.xlu1 %v2545_v24, %s2951_s25 }
 0x1c4   : > { %v978_v59 = vrot.slane %v977_v51, 1 }
 0x1c6   : > { %v856_v21 = vpop.f32.mrf.mxu1  ;;  %v3367_v7 = vmax.f32 %v977_v51, %v978_v59  ;;  %v3407_v51 = vadd.f32 %v3249_v12, %v3225_v53 }
 0x1c7   : > { %v3347_v43 = vadd.f32 %v3249_v12, %v856_v21  ;;  %v893_v21 = vrot.slane %v892_v28, 4 }
 0x1c8   : > { %4113 = vst [vmem:[#allocation20_spill] sm:$0xff] %v3407_v51  ;;  %v918_v53 = vsel %vm889_vm3, %v3407_v51, -inf }
 0x1c9   : > { %4106 = vst [vmem:[#allocation13_spill] sm:$0xff] %v3347_v43  ;;  %v981_v46 = vsel %vm889_vm3, %v3347_v43, -inf  ;;  %v894_v45 = vmax.f32 %v892_v28, %v893_v21 }
 0x1ca   : > { %v982_v33 = vmax.f32 %v980_v44, %v981_v46  ;;  %2541 = vrot.lane.b32.xlu0 %v2545_v24, %s2955_s13  ;;  %v915_v44 = vrot.slane %v914_v31, 1 }
 0x1cb   : > { %2551 = vrot.lane.b32.xlu1 %v2545_v24, %s2956_s14 }
 0x1cc   : > { %v983_v48 = vrot.slane %v982_v33, 4 }
 0x1ce   : > { %v984_v52 = vmax.f32 %v982_v33, %v983_v48  ;;  %v859_v54 = vpop.f32.mrf.mxu1  ;;  %v3401_v48 = vmax.f32 %v914_v31, %v915_v44 }
 0x1cf   : > { %v3365_v4 = vadd.f32 %v3249_v12, %v859_v54 }
 0x1d0   : > { %v985_v55 = vrot.slane %v984_v52, 2 }
 0x1d1   : > { %4108 = vst [vmem:[#allocation15_spill] sm:$0xff] %v3365_v4  ;;  %v989_v15 = vsel %vm889_vm3, %v3365_v4, -inf }
 0x1d2   : > { %v986_v63 = vmax.f32 %v984_v52, %v985_v55  ;;  %2556 = vrot.lane.b32.xlu0 %v2545_v24, %s2957_s15  ;;  %v3416_v55 = vadd.f32 %v3249_v12, %v3221_v49 }
 0x1d4   : > { %v987_v3 = vrot.slane %v986_v63, 1  ;;  %4115 = vst [vmem:[#allocation22_spill] sm:$0xff] %v3416_v55  ;;  %v917_v49 = vsel %vm889_vm3, %v3416_v55, -inf }
 0x1d6   : > { %v3369_v8 = vmax.f32 %v986_v63, %v987_v3  ;;  %v862_v9 = vpop.f32.mrf.mxu1  ;;  %v895_v63 = vrot.slane %v894_v45, 2 }
 0x1d7   : > { %v3376_v11 = vadd.f32 %v3249_v12, %v862_v9 }
 0x1d8   : > { %v2570_v13 = vpack.i.bf16 %v3369_v8, %v3367_v7  ;;  %v896_v9 = vmax.f32 %v894_v45, %v895_v63  ;;  %v3457_v63 = vadd.f32 %v3249_v12, %v3233_v61 }
 0x1d9   : > { %4110 = vst [vmem:[#allocation17_spill] sm:$0xff] %v3376_v11  ;;  %v990_v18 = vsel %vm889_vm3, %v3376_v11, -inf }
 0x1da   : > { %v991_v24 = vmax.f32 %v989_v15, %v990_v18  ;;  %2571 = vrot.lane.b32.xlu2 %v2570_v13, %s2951_s25  ;;  %2566 = vrot.lane.b32.xlu1 %v2570_v13, %s2952_s29  ;;  %v919_v15 = vmax.f32 %v917_v49, %v918_v53  ;;  %v897_v29 = vrot.slane %v896_v9, 1 }
 0x1db   : > { %2561 = vrot.lane.b32.xlu0 %v2570_v13, %s4090_s30 }
 0x1dc   : > { %v992_v27 = vrot.slane %v991_v24, 4  ;;  %v3435_v31 = vmax.f32 %v896_v9, %v897_v29 }
 0x1de   : > { %v993_v32 = vmax.f32 %v991_v24, %v992_v27  ;;  %v865_v34 = vpop.f32.mrf.mxu1  ;;  %v920_v27 = vrot.slane %v919_v15, 4 }
 0x1df   : > { %v3399_v33 = vadd.f32 %v3249_v12, %v865_v34 }
 0x1e0   : > { %v994_v40 = vrot.slane %v993_v32, 2 }
 0x1e1   : > { %4112 = vst [vmem:[#allocation19_spill] sm:$0xff] %v3399_v33  ;;  %v998_v56 = vsel %vm889_vm3, %v3399_v33, -inf }
 0x1e2   : > { %v995_v46 = vmax.f32 %v993_v32, %v994_v40  ;;  %2581 = vrot.lane.b32.xlu2 %v2570_v13, %s2954_s12  ;;  %2586 = vrot.lane.b32.xlu1 %v2570_v13, %s2956_s14  ;;  %v921_v32 = vmax.f32 %v919_v15, %v920_v27  ;;  %v927_v15 = vsel %vm889_vm3, %v3457_v63, -inf }
 0x1e3   : > { %2576 = vrot.lane.b32.xlu0 %v2570_v13, %s2955_s13 }
 0x1e4   : > { %v996_v47 = vrot.slane %v995_v46, 1  ;;  %v922_v45 = vrot.slane %v921_v32, 2 }
 0x1e6   : > { %v3403_v41 = vmax.f32 %v995_v46, %v996_v47  ;;  %v868_v50 = vpop.f32.mrf.mxu1 }
 0x1e7   : > { %v3410_v52 = vadd.f32 %v3249_v12, %v868_v50 }
 0x1e8   : > { %v2605_v54 = vpack.i.bf16 %v3401_v48, %v3403_v41 }
 0x1e9   : > { %4114 = vst [vmem:[#allocation21_spill] sm:$0xff] %v3410_v52  ;;  %v999_v59 = vsel %vm889_vm3, %v3410_v52, -inf }
 0x1ea   : > { %v1000_v3 = vmax.f32 %v998_v56, %v999_v59  ;;  %2606 = vrot.lane.b32.xlu2 %v2605_v54, %s2951_s25  ;;  %2596 = vrot.lane.b32.xlu1 %v2605_v54, %s4090_s30  ;;  %v923_v59 = vmax.f32 %v921_v32, %v922_v45 }
 0x1eb   : > { %2591 = vrot.lane.b32.xlu0 %v2570_v13, %s2957_s15 }
 0x1ec   : > { %v1001_v6 = vrot.slane %v1000_v3, 4  ;;  %v924_v9 = vrot.slane %v923_v59, 1 }
 0x1ee   : > { %v1002_v18 = vmax.f32 %v1000_v3, %v1001_v6  ;;  %v871_v22 = vpop.f32.mrf.mxu1  ;;  %v3461_v6 = vadd.f32 %v3249_v12, %v3229_v57  ;;  %v3475_v29 = vmax.f32 %v923_v59, %v924_v9 }
 0x1ef   : > { %v3433_v13 = vadd.f32 %v3249_v12, %v871_v22 }
 0x1f0   : > { %v1003_v24 = vrot.slane %v1002_v18, 2  ;;  %4118 = vst [vmem:[#allocation25_spill] sm:$0xff] %v3461_v6  ;;  %v926_v57 = vsel %vm889_vm3, %v3461_v6, -inf }
 0x1f1   : > { %4116 = vst [vmem:[#allocation23_spill] sm:$0xff] %v3433_v13  ;;  %v1007_v46 = vsel %vm889_vm3, %v3433_v13, -inf }
 0x1f2   : > { %v1004_v25 = vmax.f32 %v1002_v18, %v1003_v24  ;;  %2621 = vrot.lane.b32.xlu2 %v2605_v54, %s2956_s14  ;;  %2601 = vrot.lane.b32.xlu1 %v2605_v54, %s2952_s29  ;;  %v928_v24 = vmax.f32 %v926_v57, %v927_v15 }
 0x1f3   : > { %2616 = vrot.lane.b32.xlu0 %v2605_v54, %s2954_s12 }
 0x1f4   : > { %v1005_v28 = vrot.slane %v1004_v25, 1 }
 0x1f6   : > { %v3437_v34 = vmax.f32 %v1004_v25, %v1005_v28  ;;  %v874_v40 = vpop.f32.mrf.mxu1 }
 0x1f7   : > { %v3440_v21 = vadd.f32 %v3249_v12, %v874_v40  ;;  %v929_v40 = vrot.slane %v928_v24, 4 }
 0x1f8   : > { %v3444_v44 = vpack.i.bf16 %v3435_v31, %v3437_v34 }
 0x1f9   : > { %4117 = vst [vmem:[#allocation24_spill] sm:$0xff] %v3440_v21  ;;  %v1008_v47 = vsel %vm889_vm3, %v3440_v21, -inf }
 0x1fa   : > { %v1009_v50 = vmax.f32 %v1007_v46, %v1008_v47  ;;  %2611 = vrot.lane.b32.xlu1 %v2605_v54, %s2955_s13  ;;  %2631 = vrot.lane.b32.xlu2 %v3444_v44, %s4090_s30 }
 0x1fb   : > { %2641 = vrot.lane.b32.xlu0 %v3444_v44, %s2951_s25 }
 0x1fc   : > { %v1010_v56 = vrot.slane %v1009_v50, 4 }
 0x1fe   : > { %v1011_v3 = vmax.f32 %v1009_v50, %v1010_v56  ;;  %v877_v53 = vpop.f32.mrf.mxu1  ;;  %v930_v50 = vmax.f32 %v928_v24, %v929_v40  ;;  %v3494_v56 = vadd.f32 %v3249_v12, %v3241_v5 }
 0x1ff   : > { %v3469_v61 = vadd.f32 %v3249_v12, %v877_v53  ;;  %v3498_v53 = vadd.f32 %v3249_v12, %v3237_v1 }
 0x200   : > { %v1012_v49 = vrot.slane %v1011_v3, 2  ;;  %v931_v9 = vrot.slane %v930_v50, 2  ;;  %v936_v15 = vsel %vm889_vm3, %v3494_v56, -inf }
 0x201   : > { %4119 = vst [vmem:[#allocation26_spill] sm:$0xff] %v3469_v61  ;;  %v935_v1 = vsel %vm889_vm3, %v3498_v53, -inf }
 0x202   : > { %v1013_v18 = vmax.f32 %v1011_v3, %v1012_v49  ;;  %2626 = vrot.lane.b32.xlu1 %v2605_v54, %s2957_s15  ;;  %2646 = vrot.lane.b32.xlu2 %v3444_v44, %s2955_s13  ;;  %v1016_v54 = vsel %vm889_vm3, %v3469_v61, -inf  ;;  %v932_v57 = vmax.f32 %v930_v50, %v931_v9 }
 0x203   : > { %2656 = vrot.lane.b32.xlu0 %v3444_v44, %s2956_s14 }
 0x204   : > { %v1014_v22 = vrot.slane %v1013_v18, 1 }
 0x206   : > { %v3477_v27 = vmax.f32 %v1013_v18, %v1014_v22  ;;  %v880_v25 = vpop.f32.mrf.mxu1  ;;  %v937_v22 = vmax.f32 %v935_v1, %v936_v15 }
 0x207   : > { %v3482_v28 = vadd.f32 %v3249_v12, %v880_v25 }
 0x208   : > { %v2670_v32 = vpack.i.bf16 %v3477_v27, %v3475_v29 }
 0x209   : > { %4120 = vst [vmem:[#allocation27_spill] sm:$0xff] %v3482_v28  ;;  %v1017_v46 = vsel %vm889_vm3, %v3482_v28, -inf }
 0x20a   : > { %v1018_v47 = vmax.f32 %v1016_v54, %v1017_v46  ;;  %2636 = vrot.lane.b32.xlu1 %v3444_v44, %s2952_s29  ;;  %2666 = vrot.lane.b32.xlu2 %v2670_v32, %s4090_s30  ;;  %v2507_v46 = vpop.permute.xlu2 %2506 }
 0x20b   : > { %2671 = vrot.lane.b32.xlu0 %v2670_v32, %s2952_s29  ;;  %v2509_v36 = vunpack.i.h.bf16 %v2507_v46 }
 0x20c   : > { %v1019_v45 = vrot.slane %v1018_v47, 4 }
 0x20e   : > { %v1020_v59 = vmax.f32 %v1018_v47, %v1019_v45  ;;  %v883_v3 = vpop.f32.mrf.mxu1  ;;  %v933_v47 = vrot.slane %v932_v57, 1  ;;  %v938_v45 = vrot.slane %v937_v22, 4 }
 0x20f   : > { %v3506_v5 = vadd.f32 %v3249_v12, %v883_v3 }
 0x210   : > { %v1021_v49 = vrot.slane %v1020_v59, 2  ;;  %v939_v15 = vmax.f32 %v937_v22, %v938_v45 }
 0x211   : > { %4121 = vst [vmem:[#allocation28_spill] sm:$0xff] %v3506_v5  ;;  %v1025_v54 = vsel %vm889_vm3, %v3506_v5, -inf }
 0x212   : > { %2651 = vrot.lane.b32.xlu1 %v3444_v44, %s2954_s12  ;;  %2676 = vrot.lane.b32.xlu2 %v2670_v32, %s2951_s25  ;;  %v1022_v18 = vmax.f32 %v1020_v59, %v1021_v49  ;;  %v940_v23 = vrot.slane %v939_v15, 2 }
 0x213   : > { %2686 = vrot.lane.b32.xlu0 %v2670_v32, %s2954_s12 }
 0x214   : > { %v1023_v25 = vrot.slane %v1022_v18, 1 }
 0x216   : > { %v886_v24 = vpop.f32.mrf.mxu1  ;;  %v3521_v50 = vmax.f32 %v1022_v18, %v1023_v25 }
 0x217   : > { %v3514_v40 = vadd.f32 %v3249_v12, %v886_v24  ;;  %v3524_v12 = vmax.f32 %v932_v57, %v933_v47  ;;  %v2508_v57 = vunpack.i.l.bf16 %v2507_v46  ;;  %v2517_v47 = vpop.permute.xlu2 %2516 }
 0x218   : > { %v2519_v4 = vunpack.i.h.bf16 %v2517_v47  ;;  %v2518_v46 = vunpack.i.l.bf16 %v2517_v47 }
 0x219   : > { %4122 = vst [vmem:[#allocation29_spill] sm:$0xff] %v3514_v40  ;;  %v1026_v59 = vsel %vm889_vm3, %v3514_v40, -inf }
 0x21a   : > { %v1027_v3 = vmax.f32 %v1025_v54, %v1026_v59  ;;  %2661 = vrot.lane.b32.xlu1 %v3444_v44, %s2957_s15  ;;  %2691 = vrot.lane.b32.xlu2 %v2670_v32, %s2956_s14  ;;  %v3528_v54 = vpack.i.bf16 %v3521_v50, %v3524_v12 }
 0x21b   : > { %2696 = vrot.lane.b32.xlu0 %v2670_v32, %s2957_s15 }
 0x21c   : > { %v1028_v49 = vrot.slane %v1027_v3, 4  ;;  %v2502_v9 = vpop.permute.xlu0 %2501 }
 0x21d   : > { %v2497_v1 = vpop.permute.xlu1 %2496  ;;  %v2504_v26 = vunpack.i.h.bf16 %v2502_v9  ;;  %v2503_v59 = vunpack.i.l.bf16 %v2502_v9 }
 0x21e   : > { %v1029_v24 = vmax.f32 %v1027_v3, %v1028_v49  ;;  %v2499_v58 = vunpack.i.h.bf16 %v2497_v1  ;;  %v2498_v0 = vunpack.i.l.bf16 %v2497_v1  ;;  %v941_v1 = vmax.f32 %v939_v15, %v940_v23 }
 0x21f   : > { %v2547_v23 = vpop.permute.xlu2 %2546 }
 0x220   : > { %v1030_v44 = vrot.slane %v1029_v24, 2  ;;  %v1105_v18 = vmax.f32 %v3294_v62, %v2499_v58  ;;  %v1104_v25 = vmax.f32 %v3292_v60, %v2498_v0  ;;  %v2549_v33 = vunpack.i.h.bf16 %v2547_v23 }
 0x221   : > { %v2548_v52 = vunpack.i.l.bf16 %v2547_v23 }
 0x222   : > { %v1169_v22 = vmax.f32 %v1105_v18, %v2504_v26  ;;  %v1168_v45 = vmax.f32 %v1104_v25, %v2503_v59  ;;  %2681 = vrot.lane.b32.xlu1 %v2670_v32, %s2955_s13  ;;  %2706 = vrot.lane.b32.xlu2 %v3528_v54, %s2952_s29  ;;  %v1031_v3 = vmax.f32 %v1029_v24, %v1030_v44  ;;  %v942_v18 = vrot.slane %v941_v1, 1 }
 0x223   : > { %2701 = vrot.lane.b32.xlu0 %v3528_v54, %s4090_s30 }
 0x224   : > { %v1232_v49 = vmax.f32 %v1168_v45, %v2508_v57  ;;  %v1233_v9 = vmax.f32 %v1169_v22, %v2509_v36  ;;  %v1032_v11 = vrot.slane %v1031_v3, 1  ;;  %v3545_v25 = vmax.f32 %v941_v1, %v942_v18 }
 0x225   : > { %v2512_v58 = vpop.permute.xlu1 %2511 }
 0x226   : > { %v2514_v0 = vunpack.i.h.bf16 %v2512_v58  ;;  %v2513_v43 = vunpack.i.l.bf16 %v2512_v58  ;;  %v3543_v36 = vmax.f32 %v1031_v3, %v1032_v11 }
 0x228   : > { %v1296_v26 = vmax.f32 %v1232_v49, %v2513_v43  ;;  %v1297_v59 = vmax.f32 %v1233_v9, %v2514_v0  ;;  %v2735_v45 = vpack.i.bf16 %v3543_v36, %v3545_v25 }
 0x22a   : > { %2711 = vrot.lane.b32.xlu1 %v3528_v54, %s2951_s25  ;;  %2721 = vrot.lane.b32.xlu2 %v3528_v54, %s2954_s12  ;;  %v1360_v32 = vmax.f32 %v1296_v26, %v2518_v46  ;;  %v1361_v24 = vmax.f32 %v1297_v59, %v2519_v4 }
 0x22b   : > { %2716 = vrot.lane.b32.xlu0 %v3528_v54, %s2955_s13 }
 0x22c   : > { %v2527_v15 = vpop.permute.xlu0 %2526 }
 0x22d   : > { %v2522_v44 = vpop.permute.xlu1 %2521  ;;  %v2529_v4 = vunpack.i.h.bf16 %v2527_v15  ;;  %v2528_v49 = vunpack.i.l.bf16 %v2527_v15 }
 0x22e   : > { %v2524_v43 = vunpack.i.h.bf16 %v2522_v44  ;;  %v2523_v57 = vunpack.i.l.bf16 %v2522_v44 }
 0x22f   : > { %v1106_v9 = vmax.f32 %v3319_v20, %v2529_v4  ;;  %v1099_v58 = vmax.f32 %v3317_v19, %v2528_v49 }
 0x230   : > { %v3547_v47 = vmax.f32 %v1360_v32, %v2523_v57  ;;  %v3549_v22 = vmax.f32 %v1361_v24, %v2524_v43 }
 0x232   : > { %2736 = vrot.lane.b32.xlu1 %v2735_v45, %s2952_s29  ;;  %2731 = vrot.lane.b32.xlu2 %v2735_v45, %s4090_s30  ;;  %s2962_s29 = smov 40   ;;  %s378_s30 = sand.u32 1, %s2941_s18  }
 0x233   : > { %2726 = vrot.lane.b32.xlu0 %v3528_v54, %s2956_s14 }
 0x234   : > { %v2572_v11 = vpop.permute.xlu2 %2571  ;;  %v2532_v3 = vpop.permute.xlu0 %2531 }
 0x235   : > { %v2537_v1 = vpop.permute.xlu1 %2536  ;;  %v2534_v0 = vunpack.i.h.bf16 %v2532_v3  ;;  %v2533_v46 = vunpack.i.l.bf16 %v2532_v3 }
 0x236   : > { %v2539_v26 = vunpack.i.h.bf16 %v2537_v1  ;;  %v2538_v59 = vunpack.i.l.bf16 %v2537_v1 }
 0x237   : > { %v1163_v18 = vmax.f32 %v1099_v58, %v2533_v46  ;;  %v1170_v32 = vmax.f32 %v1106_v9, %v2534_v0 }
 0x239   : > { %v1227_v24 = vmax.f32 %v1163_v18, %v2538_v59  ;;  %v1234_v15 = vmax.f32 %v1170_v32, %v2539_v26 }
 0x23a   : > { %2751 = vrot.lane.b32.xlu1 %v2735_v45, %s2954_s12  ;;  %2746 = vrot.lane.b32.xlu2 %v2735_v45, %s2955_s13  ;;  %s4082_s12 = smov 32   ;;  %s2964_s13 = smov 56  }
 0x23b   : > { %2741 = vrot.lane.b32.xlu0 %v2735_v45, %s2951_s25  ;;  %s2961_s25 = smov 48  }
 0x23c   : > { %v2582_v44 = vpop.permute.xlu2 %2581  ;;  %v2542_v43 = vpop.permute.xlu0 %2541 }
 0x23d   : > { %v2544_v57 = vunpack.i.h.bf16 %v2542_v43  ;;  %v2543_v4 = vunpack.i.l.bf16 %v2542_v43  ;;  %v2552_v49 = vpop.permute.xlu1 %2551  ;;  %v2584_v21 = vunpack.i.h.bf16 %v2582_v44 }
 0x23e   : > { %v2554_v1 = vunpack.i.h.bf16 %v2552_v49  ;;  %v2553_v58 = vunpack.i.l.bf16 %v2552_v49 }
 0x23f   : > { %v1291_v3 = vmax.f32 %v1227_v24, %v2543_v4  ;;  %v1298_v13 = vmax.f32 %v1234_v15, %v2544_v57 }
 0x241   : > { %v1355_v9 = vmax.f32 %v1291_v3, %v2548_v52  ;;  %v1362_v0 = vmax.f32 %v1298_v13, %v2549_v33  ;;  %v2574_v3 = vunpack.i.h.bf16 %v2572_v11 }
 0x242   : > { %2771 = vrot.lane.b32.xlu1 %v3301_v2, %s2957_s15  ;;  %2756 = vrot.lane.b32.xlu2 %v2735_v45, %s2956_s14  ;;  %s4152_s14 = smov 32  }
 0x243   : > { %2766 = vrot.lane.b32.xlu0 %v2735_v45, %s2957_s15  ;;  %v1419_v46 = vmax.f32 %v1355_v9, %v2553_v58  ;;  %v1426_v26 = vmax.f32 %v1362_v0, %v2554_v1  ;;  %v2573_v1 = vunpack.i.l.bf16 %v2572_v11 }
 0x244   : > { %v3566_v59 = vpop.permute.xlu2 %2606  ;;  %v2557_v18 = vpop.permute.xlu0 %2556 }
 0x245   : > { %v2559_v32 = vunpack.i.h.bf16 %v2557_v18  ;;  %v2558_v23 = vunpack.i.l.bf16 %v2557_v18 }
 0x247   : > { %v3568_v24 = vmax.f32 %v1419_v46, %v2558_v23  ;;  %v1490_v15 = vmax.f32 %v1426_v26, %v2559_v32 }
 0x24a   : > { %2761 = vrot.lane.b32.xlu2 %v3528_v54, %s2957_s15 }
 0x24c   : > { %v3572_v33 = vpop.permute.xlu2 %2621  ;;  %v2567_v2 = vpop.permute.xlu1 %2566 }
 0x24d   : > { %v2562_v52 = vpop.permute.xlu0 %2561  ;;  %v2569_v45 = vunpack.i.h.bf16 %v2567_v2  ;;  %v2568_v57 = vunpack.i.l.bf16 %v2567_v2 }
 0x24e   : > { %v2564_v13 = vunpack.i.h.bf16 %v2562_v52  ;;  %v2563_v43 = vunpack.i.l.bf16 %v2562_v52  ;;  %v2583_v52 = vunpack.i.l.bf16 %v2582_v44 }
 0x250   : > { %v1108_v4 = vmax.f32 %v3369_v8, %v2564_v13  ;;  %v1107_v49 = vmax.f32 %v3367_v7, %v2563_v43 }
 0x252   : > { %v1172_v58 = vmax.f32 %v1108_v4, %v2569_v45  ;;  %v1171_v9 = vmax.f32 %v1107_v49, %v2568_v57 }
 0x254   : > { %v2587_v0 = vpop.permute.xlu1 %2586  ;;  %v1235_v46 = vmax.f32 %v1171_v9, %v2573_v1  ;;  %v1236_v26 = vmax.f32 %v1172_v58, %v2574_v3  ;;  %v3576_v54 = vpop.permute.xlu2 %2631 }
 0x255   : > { %v2577_v18 = vpop.permute.xlu0 %2576  ;;  %v2589_v40 = vunpack.i.h.bf16 %v2587_v0  ;;  %v2588_v13 = vunpack.i.l.bf16 %v2587_v0 }
 0x256   : > { %v2579_v32 = vunpack.i.h.bf16 %v2577_v18  ;;  %v2578_v23 = vunpack.i.l.bf16 %v2577_v18 }
 0x258   : > { %v1299_v61 = vmax.f32 %v1235_v46, %v2578_v23  ;;  %v1300_v2 = vmax.f32 %v1236_v26, %v2579_v32 }
 0x25a   : > { %v1363_v28 = vmax.f32 %v1299_v61, %v2583_v52  ;;  %v1364_v43 = vmax.f32 %v1300_v2, %v2584_v21  ;;  %v2608_v52 = vunpack.i.l.bf16 %v3566_v59 }
 0x25c   : > { %v2597_v5 = vpop.permute.xlu1 %2596  ;;  %v1427_v11 = vmax.f32 %v1363_v28, %v2588_v13  ;;  %v1428_v45 = vmax.f32 %v1364_v43, %v2589_v40  ;;  %v3578_v57 = vpop.permute.xlu2 %2646 }
 0x25d   : > { %v2592_v4 = vpop.permute.xlu0 %2591  ;;  %v2599_v1 = vunpack.i.h.bf16 %v2597_v5  ;;  %v2598_v18 = vunpack.i.l.bf16 %v2597_v5  ;;  %v2609_v5 = vunpack.i.h.bf16 %v3566_v59 }
 0x25e   : > { %v2594_v49 = vunpack.i.h.bf16 %v2592_v4  ;;  %v2593_v3 = vunpack.i.l.bf16 %v2592_v4 }
 0x25f   : > { %v1100_v46 = vmax.f32 %v3401_v48, %v2599_v1  ;;  %v1109_v40 = vmax.f32 %v3403_v41, %v2598_v18  ;;  %v2624_v18 = vunpack.i.h.bf16 %v3572_v33 }
 0x260   : > { %v1491_v58 = vmax.f32 %v1427_v11, %v2593_v3  ;;  %v1492_v9 = vmax.f32 %v1428_v45, %v2594_v49 }
 0x262   : > { %v1551_v14 = vrot.slane %v1491_v58, 7  ;;  %v1553_v44 = vrot.slane %v1492_v9, 6 }
 0x264   : > { %v1552_v21 = vsel %vm1498_vm4, %v1551_v14, %v1490_v15  ;;  %v2602_v61 = vpop.permute.xlu1 %2601  ;;  %v3582_v28 = vpop.permute.xlu2 %2666 }
 0x265   : > { %v1554_v0 = vsel %vm1500_vm5, %v1553_v44, %v1552_v21  ;;  %v2604_v26 = vunpack.i.h.bf16 %v2602_v61  ;;  %v2603_v32 = vunpack.i.l.bf16 %v2602_v61  ;;  %v2617_v23 = vpop.permute.xlu0 %2616  ;;  %v2623_v44 = vunpack.i.l.bf16 %v3572_v33 }
 0x266   : > { %v2619_v3 = vunpack.i.h.bf16 %v2617_v23  ;;  %v2618_v1 = vunpack.i.l.bf16 %v2617_v23  ;;  %v2633_v23 = vunpack.i.l.bf16 %v3576_v54 }
 0x267   : > { %v1164_v2 = vmax.f32 %v1100_v46, %v2604_v26  ;;  %v1173_v13 = vmax.f32 %v1109_v40, %v2603_v32 }
 0x269   : > { %v1228_v43 = vmax.f32 %v1164_v2, %v2609_v5  ;;  %v1237_v11 = vmax.f32 %v1173_v13, %v2608_v52  ;;  %v2634_v2 = vunpack.i.h.bf16 %v3576_v54  ;;  %v2649_v54 = vunpack.i.h.bf16 %v3578_v57 }
 0x26c   : > { %v2612_v45 = vpop.permute.xlu1 %2611  ;;  %v3588_v14 = vpop.permute.xlu2 %2676 }
 0x26d   : > { %v2614_v15 = vunpack.i.h.bf16 %v2612_v45  ;;  %v2613_v4 = vunpack.i.l.bf16 %v2612_v45  ;;  %v2642_v49 = vpop.permute.xlu0 %2641  ;;  %v1098_v45 = vmax.f32 %v3435_v31, %v2634_v2 }
 0x26f   : > { %v1292_v58 = vmax.f32 %v1228_v43, %v2614_v15  ;;  %v1301_v9 = vmax.f32 %v1237_v11, %v2613_v4  ;;  %v1110_v15 = vmax.f32 %v3437_v34, %v2633_v23 }
 0x271   : > { %v1356_v21 = vmax.f32 %v1292_v58, %v2619_v3  ;;  %v1365_v59 = vmax.f32 %v1301_v9, %v2618_v1  ;;  %v2644_v58 = vunpack.i.h.bf16 %v2642_v49  ;;  %v2643_v9 = vunpack.i.l.bf16 %v2642_v49 }
 0x273   : > { %v1420_v46 = vmax.f32 %v1356_v21, %v2624_v18  ;;  %v1429_v61 = vmax.f32 %v1365_v59, %v2623_v44  ;;  %v2648_v21 = vunpack.i.l.bf16 %v3578_v57 }
 0x274   : > { %v2627_v40 = vpop.permute.xlu1 %2626  ;;  %v3592_v26 = vpop.permute.xlu2 %2691 }
 0x275   : > { %v2628_v32 = vunpack.i.l.bf16 %v2627_v40  ;;  %v2657_v5 = vpop.permute.xlu0 %2656 }
 0x277   : > { %v1493_v52 = vmax.f32 %v1429_v61, %v2628_v32 }
 0x279   : > { %v1555_v13 = vrot.slane %v1493_v52, 5 }
 0x27b   : > { %v1556_v43 = vsel %vm1502_vm6, %v1555_v13, %v1554_v0 }
 0x27c   : > { %v2637_v11 = vpop.permute.xlu1 %2636  ;;  %v3597_v33 = vpop.permute.xlu2 %2706 }
 0x27d   : > { %v2672_v4 = vpop.permute.xlu0 %2671  ;;  %v2639_v3 = vunpack.i.h.bf16 %v2637_v11  ;;  %v2638_v1 = vunpack.i.l.bf16 %v2637_v11  ;;  %v2629_v11 = vunpack.i.h.bf16 %v2627_v40 }
 0x27f   : > { %v1162_v18 = vmax.f32 %v1098_v45, %v2639_v3  ;;  %v1174_v44 = vmax.f32 %v1110_v15, %v2638_v1  ;;  %v2659_v45 = vunpack.i.h.bf16 %v2657_v5  ;;  %v2658_v15 = vunpack.i.l.bf16 %v2657_v5 }
 0x280   : > { %v1484_v3 = vmax.f32 %v1420_v46, %v2629_v11 }
 0x281   : > { %v1226_v59 = vmax.f32 %v1162_v18, %v2644_v58  ;;  %v1238_v0 = vmax.f32 %v1174_v44, %v2643_v9  ;;  %v1537_v44 = vrot.slane %v3568_v24, 7  ;;  %v2669_v24 = vunpack.i.h.bf16 %v3582_v28 }
 0x283   : > { %v1290_v61 = vmax.f32 %v1226_v59, %v2649_v54  ;;  %v1302_v32 = vmax.f32 %v1238_v0, %v2648_v21  ;;  %v1539_v59 = vrot.slane %v1484_v3, 6 }
 0x284   : > { %v2652_v52 = vpop.permute.xlu1 %2651  ;;  %v3605_v10 = vpop.permute.xlu2 %2721 }
 0x285   : > { %v3603_v13 = vpop.permute.xlu0 %2686  ;;  %v2654_v2 = vunpack.i.h.bf16 %v2652_v52  ;;  %v2653_v23 = vunpack.i.l.bf16 %v2652_v52 }
 0x287   : > { %v1354_v39 = vmax.f32 %v1290_v61, %v2654_v2  ;;  %v1366_v49 = vmax.f32 %v1302_v32, %v2653_v23  ;;  %v2673_v23 = vunpack.i.l.bf16 %v2672_v4 }
 0x289   : > { %v1418_v9 = vmax.f32 %v1354_v39, %v2659_v45  ;;  %v1430_v18 = vmax.f32 %v1366_v49, %v2658_v15  ;;  %v2668_v39 = vunpack.i.l.bf16 %v3582_v28  ;;  %v2674_v15 = vunpack.i.h.bf16 %v2672_v4 }
 0x28a   : > { %v2709_v4 = vunpack.i.h.bf16 %v3597_v33 }
 0x28b   : > { %v1101_v45 = vmax.f32 %v3475_v29, %v2668_v39 }
 0x28c   : > { %v2662_v1 = vpop.permute.xlu1 %2661  ;;  %v2732_v0 = vpop.permute.xlu2 %2731 }
 0x28d   : > { %v3607_v35 = vpop.permute.xlu0 %2696  ;;  %v2664_v57 = vunpack.i.h.bf16 %v2662_v1  ;;  %v2663_v58 = vunpack.i.l.bf16 %v2662_v1  ;;  %v2733_v6 = vunpack.i.l.bf16 %v2732_v0 }
 0x28f   : > { %v1482_v54 = vmax.f32 %v1418_v9, %v2664_v57  ;;  %v1494_v21 = vmax.f32 %v1430_v18, %v2663_v58  ;;  %v1111_v57 = vmax.f32 %v3477_v27, %v2669_v24  ;;  %v2678_v9 = vunpack.i.l.bf16 %v3588_v14 }
 0x290   : > { %v2708_v18 = vunpack.i.l.bf16 %v3597_v33  ;;  %v2689_v33 = vunpack.i.h.bf16 %v3603_v13 }
 0x291   : > { %v1538_v40 = vsel %vm1498_vm4, %v1537_v44, %v1482_v54  ;;  %v1557_v61 = vrot.slane %v1494_v21, 4  ;;  %v1175_v44 = vmax.f32 %v1111_v57, %v2674_v15 }
 0x292   : > { %v3612_v5 = vsel %vm1500_vm5, %v1539_v59, %v1538_v40  ;;  %v2679_v59 = vunpack.i.h.bf16 %v3588_v14  ;;  %v2734_v14 = vunpack.i.h.bf16 %v2732_v0  ;;  %v1103_v0 = vmax.f32 %v3545_v25, %v2733_v6 }
 0x293   : > { %v3615_v46 = vsel %vm1504_vm7, %v1557_v61, %v1556_v43  ;;  %v1165_v43 = vmax.f32 %v1101_v45, %v2673_v23 }
 0x294   : > { %v2682_v32 = vpop.permute.xlu1 %2681  ;;  %v3618_v2 = vpop.permute.xlu2 %2746 }
 0x295   : > { %v2702_v52 = vpop.permute.xlu0 %2701  ;;  %v2683_v54 = vunpack.i.l.bf16 %v2682_v32  ;;  %v2684_v40 = vunpack.i.h.bf16 %v2682_v32  ;;  %v1229_v61 = vmax.f32 %v1165_v43, %v2678_v9  ;;  %v2748_v6 = vunpack.i.l.bf16 %v3618_v2 }
 0x296   : > { %v2703_v11 = vunpack.i.l.bf16 %v2702_v52  ;;  %v2704_v3 = vunpack.i.h.bf16 %v2702_v52 }
 0x297   : > { %v1293_v45 = vmax.f32 %v1229_v61, %v2683_v54 }
 0x298   : > { %v1102_v58 = vmax.f32 %v3524_v12, %v2703_v11  ;;  %v1112_v28 = vmax.f32 %v3521_v50, %v2704_v3  ;;  %v1239_v11 = vmax.f32 %v1175_v44, %v2679_v59  ;;  %v2688_v3 = vunpack.i.l.bf16 %v3603_v13 }
 0x299   : > { %v2723_v44 = vunpack.i.l.bf16 %v3605_v10  ;;  %v2694_v59 = vunpack.i.h.bf16 %v3592_v26  ;;  %v2724_v13 = vunpack.i.h.bf16 %v3605_v10 }
 0x29a   : > { %v1166_v39 = vmax.f32 %v1102_v58, %v2708_v18  ;;  %v1176_v37 = vmax.f32 %v1112_v28, %v2709_v4  ;;  %v1303_v57 = vmax.f32 %v1239_v11, %v2684_v40  ;;  %v1357_v32 = vmax.f32 %v1293_v45, %v2688_v3 }
 0x29b   : > { %v2693_v58 = vunpack.i.l.bf16 %v3592_v26 }
 0x29c   : > { %v2712_v49 = vpop.permute.xlu1 %2711  ;;  %v3629_v24 = vpop.permute.xlu2 %2756  ;;  %v1367_v28 = vmax.f32 %v1303_v57, %v2689_v33  ;;  %v2749_v57 = vunpack.i.h.bf16 %v3618_v2 }
 0x29d   : > { %v2717_v1 = vpop.permute.xlu0 %2716  ;;  %v2713_v21 = vunpack.i.l.bf16 %v2712_v49  ;;  %v2714_v52 = vunpack.i.h.bf16 %v2712_v49 }
 0x29e   : > { %v2718_v55 = vunpack.i.l.bf16 %v2717_v1  ;;  %v2719_v49 = vunpack.i.h.bf16 %v2717_v1  ;;  %v1421_v1 = vmax.f32 %v1357_v32, %v2693_v58  ;;  %v1431_v45 = vmax.f32 %v1367_v28, %v2694_v59 }
 0x29f   : > { %v1230_v42 = vmax.f32 %v1166_v39, %v2713_v21  ;;  %v1240_v51 = vmax.f32 %v1176_v37, %v2714_v52  ;;  %v1113_v37 = vmax.f32 %v3543_v36, %v2734_v14 }
 0x2a1   : > { %v1294_v43 = vmax.f32 %v1230_v42, %v2718_v55  ;;  %v1304_v54 = vmax.f32 %v1240_v51, %v2719_v49  ;;  %v2698_v51 = vunpack.i.l.bf16 %v3607_v35 }
 0x2a3   : > { %v1358_v55 = vmax.f32 %v1294_v43, %v2723_v44  ;;  %v1368_v26 = vmax.f32 %v1304_v54, %v2724_v13  ;;  %v1485_v33 = vmax.f32 %v1421_v1, %v2698_v51  ;;  %v2759_v54 = vunpack.i.h.bf16 %v3629_v24 }
 0x2a4   : > { %v2737_v23 = vpop.permute.xlu1 %2736  ;;  %v2762_v39 = vpop.permute.xlu2 %2761 }
 0x2a5   : > { %v2727_v15 = vpop.permute.xlu0 %2726  ;;  %v2739_v9 = vunpack.i.h.bf16 %v2737_v23  ;;  %v2738_v18 = vunpack.i.l.bf16 %v2737_v23  ;;  %v2763_v49 = vunpack.i.l.bf16 %v2762_v39  ;;  %v1541_v13 = vrot.slane %v1485_v33, 5 }
 0x2a6   : > { %v2728_v21 = vunpack.i.l.bf16 %v2727_v15  ;;  %v2729_v42 = vunpack.i.h.bf16 %v2727_v15  ;;  %v2699_v15 = vunpack.i.h.bf16 %v3607_v35 }
 0x2a7   : > { %v1167_v61 = vmax.f32 %v1103_v0, %v2738_v18  ;;  %v1177_v52 = vmax.f32 %v1113_v37, %v2739_v9  ;;  %v2764_v37 = vunpack.i.h.bf16 %v2762_v39 }
 0x2a8   : > { %v1422_v3 = vmax.f32 %v1358_v55, %v2728_v21  ;;  %v1432_v32 = vmax.f32 %v1368_v26, %v2729_v42  ;;  %v1495_v44 = vmax.f32 %v1431_v45, %v2699_v15  ;;  %v2758_v21 = vunpack.i.l.bf16 %v3629_v24 }
 0x2aa   : > { %v1486_v28 = vmax.f32 %v1422_v3, %v2763_v49  ;;  %v1496_v55 = vmax.f32 %v1432_v32, %v2764_v37 }
 0x2ac   : > { %v2752_v4 = vpop.permute.xlu1 %2751  ;;  %v1561_v26 = vrot.slane %v1496_v55, 2 }
 0x2ad   : > { %v2742_v40 = vpop.permute.xlu0 %2741  ;;  %v2754_v43 = vunpack.i.h.bf16 %v2752_v4  ;;  %v2753_v58 = vunpack.i.l.bf16 %v2752_v4 }
 0x2ae   : > { %v2744_v23 = vunpack.i.h.bf16 %v2742_v40  ;;  %v2743_v11 = vunpack.i.l.bf16 %v2742_v40 }
 0x2b0   : > { %v1231_v14 = vmax.f32 %v1167_v61, %v2743_v11  ;;  %v1241_v10 = vmax.f32 %v1177_v52, %v2744_v23  ;;  %v1543_v23 = vrot.slane %v1486_v28, 4  ;;  %v1559_v11 = vrot.slane %v1495_v44, 3 }
 0x2b2   : > { %v1295_v9 = vmax.f32 %v1231_v14, %v2748_v6  ;;  %v1305_v18 = vmax.f32 %v1241_v10, %v2749_v57  ;;  %v1542_v57 = vsel %vm1502_vm6, %v1541_v13, %v3612_v5  ;;  %v1560_v15 = vsel %vm1506_vm8, %v1559_v11, %v3615_v46 }
 0x2b3   : > { %v1544_v10 = vsel %vm1504_vm7, %v1543_v23, %v1542_v57  ;;  %v1562_v32 = vsel %vm1508_vm9, %v1561_v26, %v1560_v15 }
 0x2b4   : > { %v1359_v59 = vmax.f32 %v1295_v9, %v2753_v58  ;;  %v1369_v2 = vmax.f32 %v1305_v18, %v2754_v43  ;;  %v2772_v0 = vpop.permute.xlu1 %2771  ;;  %v1499_v58 = vsel %vm1498_vm4, %v3317_v19, %v3435_v31  ;;  %v1512_v18 = vsel %vm1498_vm4, %v3367_v7, %v3319_v20 }
 0x2b5   : > { %v2767_v35 = vpop.permute.xlu0 %2766  ;;  %v2774_v1 = vunpack.i.h.bf16 %v2772_v0  ;;  %v2773_v42 = vunpack.i.l.bf16 %v2772_v0  ;;  %v1501_v9 = vsel %vm1500_vm5, %v3401_v48, %v1499_v58  ;;  %v1513_v37 = vsel %vm1500_vm5, %v3369_v8, %v1512_v18  ;;  %v1639_v58 = vld [vmem:[%s4051_s6 + $0x38] sm:$0xff]  ;;  %v1641_v18 = vld [vmem:[%s4051_s6 + $0x48] sm:$0xff] }
 0x2b6   : > { %v2769_v40 = vunpack.i.h.bf16 %v2767_v35  ;;  %v2768_v61 = vunpack.i.l.bf16 %v2767_v35  ;;  %v1423_v4 = vmax.f32 %v1359_v59, %v2758_v21  ;;  %v1433_v52 = vmax.f32 %v1369_v2, %v2759_v54 }
 0x2b7   : > { %v1488_v39 = vmax.f32 %v3547_v47, %v2773_v42  ;;  %v1489_v24 = vmax.f32 %v3549_v22, %v2774_v1  ;;  %v1503_v44 = vsel %vm1502_vm6, %v3475_v29, %v1501_v9  ;;  %v1514_v54 = vsel %vm1502_vm6, %v3403_v41, %v1513_v37  ;;  %v1640_v9 = vld [vmem:[%s4051_s6 + $0x40] sm:$0xff]  ;;  %v1643_v37 = vld [vmem:[%s4051_s6 + $0x58] sm:$0xff] }
 0x2b8   : > { %v1487_v51 = vmax.f32 %v1423_v4, %v2768_v61  ;;  %v1497_v45 = vmax.f32 %v1433_v52, %v2769_v40  ;;  %v1505_v28 = vsel %vm1504_vm7, %v3524_v12, %v1503_v44  ;;  %v1515_v31 = vsel %vm1504_vm7, %v3437_v34, %v1514_v54  ;;  %v1642_v44 = vld [vmem:[%s4051_s6 + $0x50] sm:$0xff]  ;;  %v1645_v54 = vld [vmem:[%s4051_s6 + $0x68] sm:$0xff] }
 0x2b9   : > { %v1547_v3 = vrot.slane %v1488_v39, 2  ;;  %v1549_v33 = vrot.slane %v1489_v24, 1  ;;  %v1507_v19 = vsel %vm1506_vm8, %v3545_v25, %v1505_v28  ;;  %v1516_v7 = vsel %vm1506_vm8, %v3477_v27, %v1515_v31  ;;  %v1644_v28 = vld [vmem:[%s4051_s6 + $0x60] sm:$0xff] }
 0x2ba   : > { %v1545_v6 = vrot.slane %v1487_v51, 3  ;;  %v1563_v14 = vrot.slane %v1497_v45, 1  ;;  %v1509_v20 = vsel %vm1508_vm9, %v3292_v60, %v1507_v19  ;;  %v1517_v12 = vsel %vm1508_vm9, %v3521_v50, %v1516_v7  ;;  %v1646_v19 = vld [vmem:[%s4051_s6 + $0x70] sm:$0xff]  ;;  %v1648_v31 = vld [vmem:[%s4051_s6 + $0x80] sm:$0xff]  ;;  %v1649_v7 = vld [vmem:[%s4051_s6 + $0x88] sm:$0xff] }
 0x2bb   : > { %v1511_v41 = vsel %vm1510_vm10, %v3294_v62, %v1509_v20  ;;  %v1518_v34 = vsel %vm1510_vm10, %v3543_v36, %v1517_v12 }
 0x2bc   : > { %v1546_v47 = vsel %vm1506_vm8, %v1545_v6, %v1544_v10  ;;  %v1564_v49 = vsel %vm1510_vm10, %v1563_v14, %v1562_v32  ;;  %v1633_v32 = vld [vmem:[%s4051_s6 + $0x8] sm:$0xff] }
 0x2bd   : > { %v1548_v22 = vsel %vm1508_vm9, %v1547_v3, %v1546_v47  ;;  %v1611_v2 = vsel %vm1609_vm11, %v1518_v34, %v1564_v49  ;;  %v1632_v47 = vld [vmem:[%s4051_s6] sm:$0xff] }
 0x2be   : > { %v1550_v5 = vsel %vm1510_vm10, %v1549_v33, %v1548_v22  ;;  %v1634_v22 = vld [vmem:[%s4051_s6 + $0x10] sm:$0xff] }
 0x2bf   : > { %v2785_v43 = vpack.i.bf16 %v1550_v5, %v1564_v49  ;;  %v1610_v27 = vsel %vm1609_vm11, %v1511_v41, %v1550_v5  ;;  %v1635_v49 = vld [vmem:[%s4051_s6 + $0x18] sm:$0xff]  ;;  %v1636_v5 = vld [vmem:[%s4051_s6 + $0x20] sm:$0xff] }
 0x2c0   : > { %v1651_v41 = vld [vmem:[%s4051_s6 + $0x98] sm:$0xff] }
 0x2c1   : > { %2786 = vrot.lane.b32.xlu1 %v2785_v43, %s4084_s22  ;;  %2781 = vrot.lane.b32.xlu0 %v2785_v43, %s4086_s16  ;;  %s4148_s16 = smov 120   ;;  %s4151_s22 = smov 24  }
 0x2c2   : > { %2776 = vrot.lane.b32.xlu2 %v2785_v43, %s4088_s24 }
 0x2c9   : > { %2801 = vrot.lane.b32.xlu1 %v2785_v43, %s2961_s25  ;;  %2796 = vrot.lane.b32.xlu0 %v2785_v43, %s2962_s29  ;;  %s2327_s29 = sshll.u32 %s378_s30, 4  ;;  %s2246_s25 = scalar_lea.sflag [#allocation3], %s378_s30 }
 0x2ca   : > { %2791 = vrot.lane.b32.xlu2 %v2785_v43, %s4082_s12  ;;  %s2440_s12 = sshll.u32 %s3047_s21, 4 }
 0x2d2   : > { %2806 = vrot.lane.b32.xlu2 %v2785_v43, %s2964_s13  ;;  %v1637_v43 = vld [vmem:[%s4051_s6 + $0x28] sm:$0xff]  ;;  %s4149_s13 = smov 8  }
 0x31c   : > { %v2777_v46 = vpop.permute.xlu2 %2776 }
 0x31d   : > { %v2779_v8 = vunpack.i.h.bf16 %v2777_v46  ;;  %v2778_v29 = vunpack.i.l.bf16 %v2777_v46  ;;  %v1638_v46 = vld [vmem:[%s4051_s6 + $0x30] sm:$0xff] }
 0x31f   : > { %v1613_v0 = vsel %vm1612_vm12, %v1610_v27, %v2779_v8  ;;  %v1614_v50 = vsel %vm1612_vm12, %v1611_v2, %v2778_v29  ;;  %v1650_v29 = vld [vmem:[%s4051_s6 + $0x90] sm:$0xff] }
 0x320   : > { %v1654_v27 = vld [vmem:[%s4051_s6 + $0xb0] sm:$0xff] }
 0x324   : > { %v2792_v48 = vpop.permute.xlu2 %2791 }
 0x325   : > { %v2794_v40 = vunpack.i.h.bf16 %v2792_v48  ;;  %v2793_v61 = vunpack.i.l.bf16 %v2792_v48  ;;  %v1647_v48 = vld [vmem:[%s4051_s6 + $0x78] sm:$0xff] }
 0x32c   : > { %v2807_v1 = vpop.permute.xlu2 %2806 }
 0x32d   : > { %v2808_v26 = vunpack.i.l.bf16 %v2807_v1  ;;  %v2809_v10 = vunpack.i.h.bf16 %v2807_v1  ;;  %v1658_v1 = vld [vmem:[%s4051_s6 + $0xd0] sm:$0xff] }
 0x333   : > { %v2787_v25 = vpop.permute.xlu1 %2786  ;;  %v2782_v21 = vpop.permute.xlu0 %2781 }
 0x334   : > { %v2784_v60 = vunpack.i.h.bf16 %v2782_v21  ;;  %v2783_v59 = vunpack.i.l.bf16 %v2782_v21  ;;  %v2789_v13 = vunpack.i.h.bf16 %v2787_v25  ;;  %v2788_v55 = vunpack.i.l.bf16 %v2787_v25  ;;  %v1652_v21 = vld [vmem:[%s4051_s6 + $0xa0] sm:$0xff] }
 0x336   : > { %v1616_v62 = vsel %vm1615_vm13, %v1613_v0, %v2784_v60  ;;  %v1617_v35 = vsel %vm1615_vm13, %v1614_v50, %v2783_v59  ;;  %v1653_v60 = vld [vmem:[%s4051_s6 + $0xa8] sm:$0xff]  ;;  %v1655_v0 = vld [vmem:[%s4051_s6 + $0xb8] sm:$0xff] }
 0x337   : > { %v1618_v36 = vsel %vm679_vm2, %v1616_v62, %v2789_v13  ;;  %v1619_v42 = vsel %vm679_vm2, %v1617_v35, %v2788_v55  ;;  %v1656_v13 = vld [vmem:[%s4051_s6 + $0xc0] sm:$0xff]  ;;  %v1657_v62 = vld [vmem:[%s4051_s6 + $0xc8] sm:$0xff] }
 0x338   : > { %v1622_v45 = vsel %vm1620_vm14, %v1619_v42, %v2793_v61  ;;  %v1621_v24 = vsel %vm1620_vm14, %v1618_v36, %v2794_v40  ;;  %v1659_v42 = vld [vmem:[%s4051_s6 + $0xd8] sm:$0xff]  ;;  %v1660_v61 = vld [vmem:[%s4051_s6 + $0xe0] sm:$0xff] }
 0x33b   : > { %v2802_v4 = vpop.permute.xlu1 %2801  ;;  %v2797_v52 = vpop.permute.xlu0 %2796 }
 0x33c   : > { %v2804_v23 = vunpack.i.h.bf16 %v2802_v4  ;;  %v2803_v39 = vunpack.i.l.bf16 %v2802_v4  ;;  %v2799_v11 = vunpack.i.h.bf16 %v2797_v52  ;;  %v2798_v51 = vunpack.i.l.bf16 %v2797_v52  ;;  %v1661_v52 = vld [vmem:[%s4051_s6 + $0xe8] sm:$0xff] }
 0x33e   : > { %v1625_v3 = vsel %vm1623_vm15, %v1622_v45, %v2798_v51  ;;  %v1624_v57 = vsel %vm1623_vm15, %v1621_v24, %v2799_v11  ;;  %v1663_v51 = vld [vmem:[%s4051_s6 + $0xf8] sm:$0xff] }
 0x33f   : > { %v1628_v6 = vsel %vm1626_vm0, %v1625_v3, %v2803_v39  ;;  %v1627_v14 = vsel %vm1626_vm0, %v1624_v57, %v2804_v23  ;;  %v1662_v39 = vld [vmem:[%s4051_s6 + $0xf0] sm:$0xff] }
 0x340   : > { %v1631_v15 = vsel %vm1629_vm1, %v1628_v6, %v2808_v26  ;;  %v1630_v33 = vsel %vm1629_vm1, %v1627_v14, %v2809_v10 }
 0x341   : > { %1774 = vmatpush.msra.mxu2 %v1631_v15 }
 0x343   : > { %1775 = vmatpush.msra.mxu2 %v1630_v33 }
 0x344   : > { %2395 = vmatmul.msk.f32.vlgmr.msra.gmra.mxu2 %vm1612_vm12, %v1632_v47 }
 0x34c   : > { %2396 = vmatmul.msk.f32.gmra.mxu2 %vm1612_vm12, %v1633_v32 }
 0x354   : > { %2397 = vmatmul.msk.f32.gmra.mxu2 %vm1612_vm12, %v1634_v22 }
 0x35c   : > { %2398 = vmatmul.msk.f32.gmra.mxu2 %vm1612_vm12, %v1635_v49 }
 0x364   : > { %2399 = vmatmul.msk.f32.gmra.mxu2 %vm1612_vm12, %v1636_v5 }
 0x36c   : > { %2400 = vmatmul.msk.f32.gmra.mxu2 %vm1612_vm12, %v1637_v43 }
 0x374   : > { %2401 = vmatmul.msk.f32.gmra.mxu2 %vm1612_vm12, %v1638_v46 }
 0x37c   : > { %2402 = vmatmul.msk.f32.gmra.mxu2 %vm1612_vm12, %v1639_v58  ;;  %v4125_v58 = vld [vmem:[#allocation22_spill] sm:$0xff] }
 0x384   : > { %2403 = vmatmul.msk.f32.gmra.mxu2 %vm1612_vm12, %v1640_v9 }
 0x38c   : > { %2404 = vmatmul.msk.f32.gmra.mxu2 %vm1612_vm12, %v1641_v18 }
 0x394   : > { %2405 = vmatmul.msk.f32.gmra.mxu2 %vm1612_vm12, %v1642_v44 }
 0x39c   : > { %2406 = vmatmul.msk.f32.gmra.mxu2 %vm1612_vm12, %v1643_v37  ;;  %v4126_v37 = vld [vmem:[#allocation12_spill] sm:$0xff] }
 0x3a4   : > { %2407 = vmatmul.msk.f32.gmra.mxu2 %vm1612_vm12, %v1644_v28 }
 0x3ac   : > { %2408 = vmatmul.msk.f32.gmra.mxu2 %vm1612_vm12, %v1645_v54 }
 0x3b4   : > { %2409 = vmatmul.msk.f32.gmra.mxu2 %vm1612_vm12, %v1646_v19 }
 0x3bc   : > { %2410 = vmatmul.msk.f32.gmra.mxu2 %vm1612_vm12, %v1647_v48  ;;  %v4127_v48 = vld [vmem:[#allocation14_spill] sm:$0xff] }
 0x3c4   : > { %2411 = vmatmul.msk.f32.gmra.mxu2 %vm1612_vm12, %v1648_v31 }
 0x3c7   : > { %v3771_v20 = vpop.f32.mrf.mxu2 }
 0x3cc   : > { %2412 = vmatmul.msk.f32.gmra.mxu2 %vm1612_vm12, %v1649_v7 }
 0x3cf   : > { %v3777_v8 = vpop.f32.mrf.mxu2 }
 0x3d4   : > { %2413 = vmatmul.msk.f32.gmra.mxu2 %vm1612_vm12, %v1650_v29 }
 0x3d7   : > { %v3783_v12 = vpop.f32.mrf.mxu2 }
 0x3dc   : > { %2414 = vmatmul.msk.f32.gmra.mxu2 %vm1612_vm12, %v1651_v41  ;;  %v4128_v41 = vld [vmem:[#allocation5_spill] sm:$0xff] }
 0x3df   : > { %v3789_v25 = vpop.f32.mrf.mxu2 }
 0x3e4   : > { %2415 = vmatmul.msk.f32.gmra.mxu2 %vm1612_vm12, %v1652_v21  ;;  %v1876_v21 = vsub.f32 %v4128_v41, %v3789_v25 }
 0x3e7   : > { %v3795_v34 = vpop.f32.mrf.mxu2 }
 0x3e8   : > { %v1877_v31 = vsub.f32 %v4127_v48, %v3795_v34 }
 0x3ec   : > { %2416 = vmatmul.msk.f32.gmra.mxu2 %vm1612_vm12, %v1653_v60 }
 0x3ef   : > { %v3801_v59 = vpop.f32.mrf.mxu2 }
 0x3f0   : > { %v1878_v28 = vsub.f32 %v4126_v37, %v3801_v59  ;;  %v4129_v59 = vld [vmem:[#allocation6_spill] sm:$0xff]  ;;  %v4136_v37 = vld [vmem:[#allocation24_spill] sm:$0xff] }
 0x3f2   : > { %v1915_v60 = vmul.f32 1.442695, %v1878_v28 }
 0x3f4   : > { %2417 = vmatmul.msk.f32.gmra.mxu2 %vm1612_vm12, %v1654_v27 }
 0x3f7   : > { %v3807_v2 = vpop.f32.mrf.mxu2 }
 0x3f8   : > { %v1879_v9 = vsub.f32 %v4125_v58, %v3807_v2  ;;  %v1875_v2 = vsub.f32 %v4129_v59, %v3783_v12  ;;  %v4135_v58 = vld [vmem:[#allocation26_spill] sm:$0xff] }
 0x3fa   : > { %v1917_v7 = vmul.f32 1.442695, %v1879_v9 }
 0x3fc   : > { %2418 = vmatmul.msk.f32.gmra.mxu2 %vm1612_vm12, %v1655_v0  ;;  %v1913_v0 = vmul.f32 1.442695, %v1877_v31 }
 0x3ff   : > { %v1798_v50 = vpop.f32.mrf.mxu2 }
 0x404   : > { %2419 = vmatmul.msk.f32.gmra.mxu2 %vm1612_vm12, %v1656_v13  ;;  %v4130_v13 = vld [vmem:[#allocation16_spill] sm:$0xff] }
 0x407   : > { %v1801_v55 = vpop.f32.mrf.mxu2 }
 0x40c   : > { %2420 = vmatmul.msk.f32.gmra.mxu2 %vm1612_vm12, %v1657_v62  ;;  %v1911_v62 = vmul.f32 1.442695, %v1876_v21 }
 0x40f   : > { %v1804_v35 = vpop.f32.mrf.mxu2 }
 0x414   : > { %2421 = vmatmul.msk.f32.gmra.mxu2 %vm1612_vm12, %v1658_v1 }
 0x417   : > { %v1807_v36 = vpop.f32.mrf.mxu2 }
 0x418   : > { %v1883_v47 = vsub.f32 %v3498_v53, %v1807_v36  ;;  %v1909_v36 = vmul.f32 1.442695, %v1875_v2 }
 0x41c   : > { %2422 = vmatmul.msk.f32.gmra.mxu2 %vm1612_vm12, %v1659_v42 }
 0x41f   : > { %v1810_v40 = vpop.f32.mrf.mxu2 }
 0x420   : > { %v1884_v10 = vsub.f32 %v3494_v56, %v1810_v40  ;;  %v4124_v56 = vld [vmem:[#allocation20_spill] sm:$0xff] }
 0x421   : > { %v1880_v43 = vsub.f32 %v4124_v56, %v1798_v50 }
 0x422   : > { %v1927_v22 = vmul.f32 1.442695, %v1884_v10  ;;  %v1971_v10 = vld [vmem:[%s4050_s5 + $0x10] sm:$0xff] }
 0x423   : > { %v1919_v54 = vmul.f32 1.442695, %v1880_v43  ;;  %v4134_v43 = vld [vmem:[#allocation29_spill] sm:$0xff] }
 0x424   : > { %2423 = vmatmul.msk.f32.gmra.mxu2 %vm1612_vm12, %v1660_v61 }
 0x427   : > { %v1813_v4 = vpop.f32.mrf.mxu2 }
 0x428   : > { %v1885_v57 = vsub.f32 %v3256_v17, %v1813_v4  ;;  %v1925_v17 = vmul.f32 1.442695, %v1883_v47  ;;  %v1973_v47 = vld [vmem:[%s4050_s5 + $0x20] sm:$0xff] }
 0x42a   : > { %v1929_v33 = vmul.f32 1.442695, %v1885_v57 }
 0x42c   : > { %2424 = vmatmul.msk.f32.gmra.mxu2 %vm1612_vm12, %v1661_v52 }
 0x42f   : > { %v1816_v23 = vpop.f32.mrf.mxu2 }
 0x430   : > { %v1886_v26 = vsub.f32 %v3253_v16, %v1816_v23 }
 0x432   : > { %v1931_v15 = vmul.f32 1.442695, %v1886_v26 }
 0x434   : > { %2425 = vmatmul.msk.f32.gmra.mxu2 %vm1612_vm12, %v1662_v39 }
 0x437   : > { %v1819_v11 = vpop.f32.mrf.mxu2 }
 0x438   : > { %v1887_v45 = vsub.f32 %v3266_v30, %v1819_v11  ;;  %v1882_v30 = vsub.f32 %v3457_v63, %v1804_v35  ;;  %v4131_v35 = vld [vmem:[#allocation18_spill] sm:$0xff] }
 0x439   : > { %v1873_v1 = vsub.f32 %v4131_v35, %v3771_v20 }
 0x43a   : > { %v1933_v6 = vmul.f32 1.442695, %v1887_v45  ;;  %v1923_v46 = vmul.f32 1.442695, %v1882_v30  ;;  %v1975_v30 = vld [vmem:[%s4050_s5 + $0x30] sm:$0xff] }
 0x43b   : > { %v1905_v61 = vmul.f32 1.442695, %v1873_v1 }
 0x43c   : > { %2426 = vmatmul.msk.f32.gmra.mxu2 %vm1612_vm12, %v1663_v51 }
 0x43f   : > { %v1822_v24 = vpop.f32.mrf.mxu2 }
 0x440   : > { %v1888_v3 = vsub.f32 %v3274_v38, %v1822_v24  ;;  %v4123_v38 = vld [vmem:[#allocation25_spill] sm:$0xff] }
 0x441   : > { %v1881_v49 = vsub.f32 %v4123_v38, %v1801_v55  ;;  %v1874_v55 = vsub.f32 %v4130_v13, %v3777_v8  ;;  %v4132_v38 = vld [vmem:[#allocation28_spill] sm:$0xff] }
 0x442   : > { %v1935_v14 = vmul.f32 1.442695, %v1888_v3 }
 0x443   : > { %v1921_v18 = vmul.f32 1.442695, %v1881_v49  ;;  %v1907_v42 = vmul.f32 1.442695, %v1874_v55 }
 0x444   : > { %2815 = vpow2.f32 %v1935_v14 }
 0x445   : > { %2817 = vpow2.f32 %v1933_v6  ;;  %v1969_v6 = vld [vmem:[%s4050_s5] sm:$0xff] }
 0x446   : > { %2819 = vpow2.f32 %v1931_v15 }
 0x447   : > { %v3851_v32 = vpop.f32.mrf.mxu2  ;;  %2821 = vpow2.f32 %v1929_v33 }
 0x448   : > { %2823 = vpow2.f32 %v1927_v22 }
 0x449   : > { %2825 = vpow2.f32 %v1925_v17 }
 0x44a   : > { %v2816_v16 = vpop.eup %2815  ;;  %2827 = vpow2.f32 %v1923_v46 }
 0x44b   : > { %1981 = vmatpush.msra.mxu3 %v2816_v16  ;;  %v2818_v5 = vpop.eup %2817  ;;  %2829 = vpow2.f32 %v1921_v18  ;;  %v1977_v16 = vld [vmem:[%s4050_s5 + $0x40] sm:$0xff] }
 0x44c   : > { %v2820_v53 = vpop.eup %2819  ;;  %2831 = vpow2.f32 %v1919_v54 }
 0x44d   : > { %1982 = vmatpush.msra.mxu3 %v2818_v5  ;;  %v2822_v44 = vpop.eup %2821  ;;  %2833 = vpow2.f32 %v1917_v7  ;;  %v4133_v5 = vld [vmem:[#allocation27_spill] sm:$0xff]  ;;  %v4138_v7 = vld [vmem:[#allocation21_spill] sm:$0xff] }
 0x44e   : > { %v2824_v19 = vpop.eup %2823  ;;  %2835 = vpow2.f32 %v1915_v60  ;;  %v4139_v60 = vld [vmem:[#allocation19_spill] sm:$0xff] }
 0x44f   : > { %v3858_v63 = vpop.f32.mrf.mxu2  ;;  %1983 = vmatpush.msra.mxu3 %v2820_v53  ;;  %v2826_v29 = vpop.eup %2825  ;;  %2837 = vpow2.f32 %v1913_v0  ;;  %v1979_v53 = vld [vmem:[%s4050_s5 + $0x50] sm:$0xff]  ;;  %v4140_v0 = vld [vmem:[#allocation17_spill] sm:$0xff] }
 0x450   : > { %v2828_v27 = vpop.eup %2827  ;;  %2839 = vpow2.f32 %v1911_v62  ;;  %v4141_v62 = vld [vmem:[#allocation15_spill] sm:$0xff] }
 0x451   : > { %1984 = vmatpush.msra.mxu3 %v2822_v44  ;;  %v2830_v34 = vpop.eup %2829  ;;  %2841 = vpow2.f32 %v1909_v36  ;;  %v4142_v36 = vld [vmem:[#allocation13_spill] sm:$0xff] }
 0x452   : > { %v2832_v25 = vpop.eup %2831  ;;  %2843 = vpow2.f32 %v1907_v42 }
 0x453   : > { %1985 = vmatpush.msra.mxu3 %v2824_v19  ;;  %v2834_v12 = vpop.eup %2833  ;;  %2845 = vpow2.f32 %v1905_v61  ;;  %v4137_v19 = vld [vmem:[#allocation23_spill] sm:$0xff] }
 0x454   : > { %v2836_v40 = vpop.eup %2835  ;;  %v4143_v61 = vld [vmem:[#allocation11_spill] sm:$0xff] }
 0x455   : > { %1986 = vmatpush.msra.mxu3 %v2826_v29  ;;  %v2838_v8 = vpop.eup %2837 }
 0x456   : > { %v2840_v52 = vpop.eup %2839 }
 0x457   : > { %v3868_v50 = vpop.f32.mrf.mxu2  ;;  %1987 = vmatpush.msra.mxu3 %v2828_v27  ;;  %v2842_v20 = vpop.eup %2841 }
 0x458   : > { %v2844_v23 = vpop.eup %2843 }
 0x459   : > { %1988 = vmatpush.msra.mxu3 %v2830_v34  ;;  %v2846_v11 = vpop.eup %2845 }
 0x45b   : > { %1989 = vmatpush.msra.mxu3 %v2832_v25 }
 0x45d   : > { %1990 = vmatpush.msra.mxu3 %v2834_v12 }
 0x45f   : > { %v3874_v4 = vpop.f32.mrf.mxu2  ;;  %1991 = vmatpush.msra.mxu3 %v2836_v40 }
 0x461   : > { %1992 = vmatpush.msra.mxu3 %v2838_v8 }
 0x463   : > { %1993 = vmatpush.msra.mxu3 %v2840_v52 }
 0x465   : > { %1994 = vmatpush.msra.mxu3 %v2842_v20 }
 0x467   : > { %v3876_v39 = vpop.f32.mrf.mxu2  ;;  %1995 = vmatpush.msra.mxu3 %v2844_v23  ;;  %v4144_v23 = vld [vmem:[#allocation9_spill] sm:$0xff] }
 0x468   : > { %v1893_v8 = vsub.f32 %v4143_v61, %v3876_v39  ;;  %v4146_v39 = vld [vmem:[#allocation8_spill] sm:$0xff] }
 0x469   : > { %1996 = vmatpush.msra.mxu3 %v2846_v11  ;;  %v1892_v11 = vsub.f32 %v4144_v23, %v3874_v4  ;;  %v4147_v4 = vld [vmem:[#allocation7_spill] sm:$0xff] }
 0x46a   : > { %1997 = vmatmul.f32.vlgmr.msra.gmra.mxu3 %v1969_v6  ;;  %v1890_v6 = vsub.f32 %v4146_v39, %v3858_v63 }
 0x46f   : > { %v3878_v51 = vpop.f32.mrf.mxu2 }
 0x470   : > { %v1894_v12 = vsub.f32 %v4142_v36, %v3878_v51  ;;  %v4145_v51 = vld [vmem:[#allocation10_spill] sm:$0xff] }
 0x472   : > { %2000 = vmatmul.f32.gmra.mxu3 %v1971_v10 }
 0x477   : > { %v1843_v45 = vpop.f32.mrf.mxu2 }
 0x478   : > { %v1895_v25 = vsub.f32 %v4141_v62, %v1843_v45  ;;  %v1947_v45 = vmul.f32 1.442695, %v1894_v12 }
 0x47a   : > { %2003 = vmatmul.f32.gmra.mxu3 %v1973_v47  ;;  %v1949_v52 = vmul.f32 1.442695, %v1895_v25  ;;  %v2068_v25 = vld [vmem:[%s4052_s7 + $0x28] sm:$0xff] }
 0x47f   : > { %v1846_v24 = vpop.f32.mrf.mxu2 }
 0x480   : > { %v1896_v34 = vsub.f32 %v4140_v0, %v1846_v24 }
 0x482   : > { %2006 = vmatmul.f32.gmra.mxu3 %v1975_v30  ;;  %v1951_v42 = vmul.f32 1.442695, %v1896_v34  ;;  %v1939_v30 = vmul.f32 1.442695, %v1890_v6 }
 0x487   : > { %v1849_v26 = vpop.f32.mrf.mxu2 }
 0x488   : > { %v1897_v27 = vsub.f32 %v4139_v60, %v1849_v26  ;;  %v1891_v26 = vsub.f32 %v4145_v51, %v3868_v50  ;;  %v2812_v50 = vld [vmem:[%s4053_s8] ss:$0 sm:$0xff]  ;;  %v2066_v51 = vld [vmem:[%s4052_s7 + $0x18] sm:$0xff] }
 0x489   : > { %2151 = vrot.lane.b32.xlu1 %v2812_v50, %s4088_s24  ;;  %s2257_s24 = scalar_lea.hbm %s4056_s11, %s2440_s12 }
 0x48a   : > { %2009 = vmatmul.f32.gmra.mxu3 %v1977_v16  ;;  %v1953_v35 = vmul.f32 1.442695, %v1897_v27  ;;  %v1941_v47 = vmul.f32 1.442695, %v1891_v26  ;;  %v2065_v26 = vld [vmem:[%s4052_s7 + $0x10] sm:$0xff]  ;;  %s2260_s21 = sshll.u32 %s2257_s24, 4  ;;  %s2261_s21 = int_to_ptr.hbm [resolvable:$true] %s2260_s21 }
 0x48f   : > { %v1852_v3 = vpop.f32.mrf.mxu2 }
 0x490   : > { %v1898_v29 = vsub.f32 %v4138_v7, %v1852_v3  ;;  %v1945_v3 = vmul.f32 1.442695, %v1893_v8 }
 0x492   : > { %2012 = vmatmul.f32.gmra.mxu3 %v1979_v53  ;;  %v1955_v13 = vmul.f32 1.442695, %v1898_v29  ;;  %v1978_v53 = vld [vmem:[%s4050_s5 + $0x48] sm:$0xff] }
 0x497   : > { %v1855_v57 = vpop.f32.mrf.mxu2 }
 0x498   : > { %v1899_v48 = vsub.f32 %v4137_v19, %v1855_v57 }
 0x49a   : > { %v1957_v59 = vmul.f32 1.442695, %v1899_v48 }
 0x49f   : > { %v1858_v14 = vpop.f32.mrf.mxu2 }
 0x4a0   : > { %v1900_v28 = vsub.f32 %v4136_v37, %v1858_v14  ;;  %v1943_v14 = vmul.f32 1.442695, %v1892_v11 }
 0x4a2   : > { %v1959_v41 = vmul.f32 1.442695, %v1900_v28 }
 0x4a7   : > { %v1861_v15 = vpop.f32.mrf.mxu2 }
 0x4a8   : > { %v1901_v9 = vsub.f32 %v4135_v58, %v1861_v15  ;;  %v1889_v15 = vsub.f32 %v4147_v4, %v3851_v32  ;;  %v1980_v58 = vld [vmem:[%s4050_s5 + $0x58] sm:$0xff] }
 0x4aa   : > { %v1961_v31 = vmul.f32 1.442695, %v1901_v9 }
 0x4af   : > { %v1864_v33 = vpop.f32.mrf.mxu2 }
 0x4b0   : > { %v1902_v56 = vsub.f32 %v4133_v5, %v1864_v33 }
 0x4b2   : > { %v1963_v54 = vmul.f32 1.442695, %v1902_v56  ;;  %v1972_v56 = vld [vmem:[%s4050_s5 + $0x18] sm:$0xff] }
 0x4b7   : > { %v1867_v22 = vpop.f32.mrf.mxu2 }
 0x4b8   : > { %v1903_v49 = vsub.f32 %v4132_v38, %v1867_v22  ;;  %v1937_v22 = vmul.f32 1.442695, %v1889_v15 }
 0x4ba   : > { %v1965_v18 = vmul.f32 1.442695, %v1903_v49 }
 0x4bf   : > { %v1870_v17 = vpop.f32.mrf.mxu2 }
 0x4c0   : > { %v1904_v46 = vsub.f32 %v4134_v43, %v1870_v17  ;;  %v1970_v17 = vld [vmem:[%s4050_s5 + $0x8] sm:$0xff] }
 0x4c1   : > { %v1974_v43 = vld [vmem:[%s4050_s5 + $0x28] sm:$0xff] }
 0x4c2   : > { %v1967_v44 = vmul.f32 1.442695, %v1904_v46  ;;  %v1976_v46 = vld [vmem:[%s4050_s5 + $0x38] sm:$0xff] }
 0x4c4   : > { %2847 = vpow2.f32 %v1967_v44 }
 0x4c5   : > { %2849 = vpow2.f32 %v1965_v18 }
 0x4c6   : > { %2851 = vpow2.f32 %v1963_v54 }
 0x4c7   : > { %2853 = vpow2.f32 %v1961_v31 }
 0x4c8   : > { %2855 = vpow2.f32 %v1959_v41 }
 0x4c9   : > { %2857 = vpow2.f32 %v1957_v59 }
 0x4ca   : > { %v2848_v21 = vpop.eup %2847  ;;  %2859 = vpow2.f32 %v1955_v13  ;;  %v2070_v13 = vld [vmem:[%s4052_s7 + $0x38] sm:$0xff] }
 0x4cb   : > { %2016 = vmatpush.msrb.mxu3 %v2848_v21  ;;  %v2850_v2 = vpop.eup %2849  ;;  %2861 = vpow2.f32 %v1953_v35 }
 0x4cc   : > { %v2852_v55 = vpop.eup %2851  ;;  %2863 = vpow2.f32 %v1951_v42 }
 0x4cd   : > { %2017 = vmatpush.msrb.mxu3 %v2850_v2  ;;  %v2854_v1 = vpop.eup %2853  ;;  %2865 = vpow2.f32 %v1949_v52 }
 0x4ce   : > { %v2856_v40 = vpop.eup %2855  ;;  %2867 = vpow2.f32 %v1947_v45 }
 0x4cf   : > { %2018 = vmatpush.msrb.mxu3 %v2852_v55  ;;  %v2858_v20 = vpop.eup %2857  ;;  %2869 = vpow2.f32 %v1945_v3  ;;  %v2069_v55 = vld [vmem:[%s4052_s7 + $0x30] sm:$0xff]  ;;  %v2064_v3 = vld [vmem:[%s4052_s7 + $0x8] sm:$0xff] }
 0x4d0   : > { %v2860_v24 = vpop.eup %2859  ;;  %2871 = vpow2.f32 %v1943_v14 }
 0x4d1   : > { %2019 = vmatpush.msrb.mxu3 %v2854_v1  ;;  %v2862_v57 = vpop.eup %2861  ;;  %2873 = vpow2.f32 %v1941_v47 }
 0x4d2   : > { %v2864_v10 = vpop.eup %2863  ;;  %2875 = vpow2.f32 %v1939_v30 }
 0x4d3   : > { %2020 = vmatpush.msrb.mxu3 %v2856_v40  ;;  %v2866_v33 = vpop.eup %2865  ;;  %2877 = vpow2.f32 %v1937_v22 }
 0x4d4   : > { %v2868_v63 = vpop.eup %2867 }
 0x4d5   : > { %2021 = vmatpush.msrb.mxu3 %v2858_v20  ;;  %v2870_v16 = vpop.eup %2869 }
 0x4d6   : > { %v2872_v32 = vpop.eup %2871 }
 0x4d7   : > { %2022 = vmatpush.msrb.mxu3 %v2860_v24  ;;  %v2874_v38 = vpop.eup %2873  ;;  %v2067_v24 = vld [vmem:[%s4052_s7 + $0x20] sm:$0xff] }
 0x4d8   : > { %v2876_v49 = vpop.eup %2875 }
 0x4d9   : > { %2023 = vmatpush.msrb.mxu3 %v2862_v57  ;;  %v2878_v5 = vpop.eup %2877  ;;  %v2063_v57 = vld [vmem:[%s4052_s7] sm:$0xff] }
 0x4db   : > { %2024 = vmatpush.msrb.mxu3 %v2864_v10 }
 0x4dd   : > { %2025 = vmatpush.msrb.mxu3 %v2866_v33 }
 0x4df   : > { %2026 = vmatpush.msrb.mxu3 %v2868_v63 }
 0x4e1   : > { %2027 = vmatpush.msrb.mxu3 %v2870_v16 }
 0x4e3   : > { %2028 = vmatpush.msrb.mxu3 %v2872_v32 }
 0x4e5   : > { %2029 = vmatpush.msrb.mxu3 %v2874_v38 }
 0x4e7   : > { %2030 = vmatpush.msrb.mxu3 %v2876_v49 }
 0x4e9   : > { %2031 = vmatpush.msrb.mxu3 %v2878_v5 }
 0x4ea   : > { %2032 = vmatmul.f32.vlgmr.msrb.gmra.mxu3 %v1970_v17 }
 0x4eb   : > { %2109 = vmatpush.msra.mxu3 %v2070_v13 }
 0x4ed   : > { %v1998_v9 = vpop.f32.mrf.mxu3  ;;  %2110 = vmatpush.msra.mxu3 %v2069_v55 }
 0x4ef   : > { %2111 = vmatpush.msra.mxu3 %v2068_v25 }
 0x4f1   : > { %2112 = vmatpush.msra.mxu3 %v2067_v24 }
 0x4f2   : > { %2035 = vmatmul.f32.gmra.mxu3 %v1972_v56 }
 0x4f3   : > { %2113 = vmatpush.msra.mxu3 %v2066_v51 }
 0x4f5   : > { %v2001_v18 = vpop.f32.mrf.mxu3  ;;  %2114 = vmatpush.msra.mxu3 %v2065_v26 }
 0x4f7   : > { %2115 = vmatpush.msra.mxu3 %v2064_v3 }
 0x4f9   : > { %2116 = vmatpush.msra.mxu3 %v2063_v57 }
 0x4fa   : > { %2038 = vmatmul.f32.gmra.mxu3 %v1974_v43 }
 0x4fb   : > { %v2152_v42 = vpop.permute.xlu1 %2151  ;;  %2174 = vmatpush.msrb.mxu3 %v2070_v13 }
 0x4fd   : > { %v2004_v44 = vpop.f32.mrf.mxu3  ;;  %2175 = vmatpush.msrb.mxu3 %v2069_v55 }
 0x4ff   : > { %2176 = vmatpush.msrb.mxu3 %v2068_v25 }
 0x501   : > { %2177 = vmatpush.msrb.mxu3 %v2067_v24 }
 0x502   : > { %2041 = vmatmul.f32.gmra.mxu3 %v1976_v46 }
 0x503   : > { %2178 = vmatpush.msrb.mxu3 %v2066_v51 }
 0x505   : > { %v2007_v37 = vpop.f32.mrf.mxu3  ;;  %2179 = vmatpush.msrb.mxu3 %v2065_v26 }
 0x507   : > { %2180 = vmatpush.msrb.mxu3 %v2064_v3 }
 0x509   : > { %2181 = vmatpush.msrb.mxu3 %v2063_v57 }
 0x50a   : > { %2044 = vmatmul.f32.gmra.mxu3 %v1978_v53 }
 0x50d   : > { %v2010_v28 = vpop.f32.mrf.mxu3 }
 0x512   : > { %2047 = vmatmul.f32.gmra.mxu3 %v1980_v58 }
 0x515   : > { %v2013_v54 = vpop.f32.mrf.mxu3 }
 0x56d   : > { %v2033_v19 = vpop.f32.mrf.mxu3 }
 0x56e   : > { %v2034_v48 = vadd.f32 %v2033_v19, %v1998_v9 }
 0x570   : > { %2879 = vrcp.f32 %v2034_v48  ;;  %2077 = vrot.lane.b32.xlu0 %v2034_v48, %s4148_s16  ;;  %v2154_v61 = vmul.f32 %v2152_v42, %v2034_v48 }
 0x575   : > { %v2036_v31 = vpop.f32.mrf.mxu3 }
 0x576   : > { %v2880_v7 = vpop.eup %2879  ;;  %v2037_v29 = vadd.f32 %v2036_v31, %v2001_v18 }
 0x577   : > { %v2053_v41 = vmul.f32 %v2880_v7, %v2034_v48 }
 0x578   : > { %2881 = vrcp.f32 %v2037_v29  ;;  %2079 = vrot.lane.b32.xlu2 %v2037_v29, %s4148_s16  ;;  %v2155_v23 = vmul.f32 %v2152_v42, %v2037_v29 }
 0x579   : > { %v2055_v21 = vsub.f32 2.0, %v2053_v41 }
 0x57b   : > { %v2057_v2 = vmul.f32 %v2880_v7, %v2055_v21 }
 0x57d   : > { %v2039_v60 = vpop.f32.mrf.mxu3 }
 0x57e   : > { %v2882_v27 = vpop.eup %2881  ;;  %v2040_v59 = vadd.f32 %v2039_v60, %v2004_v44  ;;  %v2813_v60 = vld [vmem:[%s4054_s9] ss:$0 sm:$0xff] }
 0x57f   : > { %v2054_v0 = vmul.f32 %v2882_v27, %v2037_v29 }
 0x580   : > { %v3944_v34 = vmul.f32 %v2057_v2, %v2040_v59  ;;  %2081 = vrot.lane.b32.xlu0 %v2040_v59, %s4148_s16 }
 0x581   : > { %v2056_v62 = vsub.f32 2.0, %v2054_v0 }
 0x583   : > { %v2058_v36 = vmul.f32 %v2882_v27, %v2056_v62 }
 0x585   : > { %v2042_v35 = vpop.f32.mrf.mxu3 }
 0x586   : > { %v2043_v1 = vadd.f32 %v2042_v35, %v2007_v37 }
 0x588   : > { %v3956_v12 = vmul.f32 %v2058_v36, %v2043_v1  ;;  %2083 = vrot.lane.b32.xlu1 %v2043_v1, %s4148_s16 }
 0x58d   : > { %v2045_v40 = vpop.f32.mrf.mxu3 }
 0x58e   : > { %v2046_v8 = vadd.f32 %v2045_v40, %v2010_v28 }
 0x590   : > { %2085 = vrot.lane.b32.xlu2 %v2046_v8, %s4148_s16  ;;  %2158 = vrot.lane.b32.xlu1 %v2154_v61, %s4148_s16  ;;  %v2061_v45 = vmul.f32 %v2057_v2, %v2046_v8  ;;  %v2814_v2 = vld [vmem:[%s4055_s10] ss:$0 sm:$0xff] }
 0x595   : > { %v2048_v52 = vpop.f32.mrf.mxu3 }
 0x596   : > { %v2049_v20 = vadd.f32 %v2048_v52, %v2013_v54 }
 0x598   : > { %v2062_v11 = vmul.f32 %v2058_v36, %v2049_v20  ;;  %2160 = vrot.lane.b32.xlu2 %v2155_v23, %s4148_s16  ;;  %2087 = vrot.lane.b32.xlu0 %v2049_v20, %s4148_s16  ;;  %s2901_s16 = sshra.s32 %s2261_s21, 4  ;;  %s2902_s16 = int_to_ptr.hbm [resolvable:$true] %s2901_s16 }
 0x599   : > { %p2908_p0 = scmp.lt.s32.totalorder %s2902_s16, %s4056_s11 }
 0x59a   : > { %2195 = vrot.lane.b32.xlu1 %v2062_v11, %s4149_s13 }
 0x5a0   : > { %2193 = vrot.lane.b32.xlu0 %v2061_v45, %s4149_s13 }
 0x5d2   : > { %v2080_v6 = vpop.permute.xlu2 %2079 }
 0x5e2   : > { %v2078_v39 = vpop.permute.xlu0 %2077 }
 0x5e3   : > { %2427 = vmatmul.msk.f32.vlgmr.msra.gmra.mxu3 %vm1629_vm1, %v2078_v39 }
 0x5ea   : > { %v2086_v4 = vpop.permute.xlu2 %2085 }
 0x5eb   : > { %2428 = vmatmul.msk.f32.gmra.mxu3 %vm1629_vm1, %v2080_v6 }
 0x5f2   : > { %v2082_v14 = vpop.permute.xlu0 %2081  ;;  %v2161_v50 = vpop.permute.xlu2 %2160 }
 0x5f3   : > { %2429 = vmatmul.msk.f32.gmra.mxu3 %vm1629_vm1, %v2082_v14 }
 0x5fa   : > { %v2084_v10 = vpop.permute.xlu1 %2083 }
 0x5fb   : > { %2430 = vmatmul.msk.f32.gmra.mxu3 %vm1629_vm1, %v2084_v10 }
 0x602   : > { %v2159_v47 = vpop.permute.xlu1 %2158 }
 0x603   : > { %2431 = vmatmul.msk.f32.gmra.mxu3 %vm1629_vm1, %v2086_v4 }
 0x60a   : > { %v2088_v15 = vpop.permute.xlu0 %2087 }
 0x60b   : > { %2432 = vmatmul.msk.f32.gmra.mxu3 %vm1629_vm1, %v2088_v15 }
 0x60c   : > { %v2196_v31 = vpop.permute.xlu1 %2195 }
 0x612   : > { %v2194_v48 = vpop.permute.xlu0 %2193 }
 0x613   : > { %2433 = vmatmul.msk.f32.vlgmr.msrb.gmra.mxu3 %vm1629_vm1, %v2159_v47  ;;  %v2223_v21 = vsel %vm1609_vm11, %v3944_v34, %v2194_v48  ;;  %v2224_v34 = vsel %vm1609_vm11, %v3956_v12, %v2196_v31 }
 0x61b   : > { %2434 = vmatmul.msk.f32.gmra.mxu3 %vm1629_vm1, %v2161_v50 }
 0x666   : > { %v2118_v33 = vpop.f32.mrf.mxu3 }
 0x667   : > { %2883 = vrcp.f32 %v2118_v33 }
 0x66d   : > { %v2884_v30 = vpop.eup %2883 }
 0x66e   : > { %v2138_v63 = vmul.f32 %v2884_v30, %v2118_v33  ;;  %v2121_v22 = vpop.f32.mrf.mxu3 }
 0x66f   : > { %2885 = vrcp.f32 %v2121_v22 }
 0x670   : > { %v2140_v16 = vsub.f32 2.0, %v2138_v63 }
 0x672   : > { %v2142_v38 = vmul.f32 %v2884_v30, %v2140_v16 }
 0x675   : > { %v2886_v32 = vpop.eup %2885 }
 0x676   : > { %v2139_v49 = vmul.f32 %v2886_v32, %v2121_v22  ;;  %v2124_v17 = vpop.f32.mrf.mxu3 }
 0x677   : > { %v2144_v5 = vmul.f32 %v2142_v38, %v2124_v17 }
 0x678   : > { %v2141_v56 = vsub.f32 2.0, %v2139_v49 }
 0x679   : > { %2201 = vrot.lane.b32.xlu2 %v2144_v5, %s4150_s0 }
 0x67a   : > { %v2143_v43 = vmul.f32 %v2886_v32, %v2141_v56 }
 0x67e   : > { %v2127_v46 = vpop.f32.mrf.mxu3 }
 0x67f   : > { %v2145_v53 = vmul.f32 %v2143_v43, %v2127_v46 }
 0x681   : > { %2203 = vrot.lane.b32.xlu0 %v2145_v53, %s4150_s0  ;;  %s380_s0 = scalar_lea.vmem [#allocation2], %s2327_s29  ;;  %s2903_s29 = scalar_lea.hbm %s2902_s16, 16 }
 0x682   : > { %s2258_s15 = sshll.u32 %s380_s0, 4  ;;  %p2904_p11 = scmp.ne.s32.totalorder %s2902_s16, %s2903_s29  ;;  %s2259_s15 = int_to_ptr.vmem [resolvable:$true] %s2258_s15 }
 0x684   : > { %p2905_p12 = pnand %p2904_p11, %p3064_p5 }
 0x686   : > { %v2130_v58 = vpop.f32.mrf.mxu3  ;;  %p2906_p13 = pneg %p2905_p12 }
 0x687   : > { %v2146_v9 = vmul.f32 %v2142_v38, %v2130_v58 }
 0x689   : > { %2209 = vrot.lane.b32.xlu1 %v2146_v9, %s4151_s22 }
 0x68e   : > { %v2133_v18 = vpop.f32.mrf.mxu3 }
 0x68f   : > { %v2147_v44 = vmul.f32 %v2143_v43, %v2133_v18 }
 0x691   : > { %2211 = vrot.lane.b32.xlu2 %v2147_v44, %s4151_s22 }
 0x696   : > { %v2183_v37 = vpop.f32.mrf.mxu3 }
 0x697   : > { %v2189_v28 = vmul.f32 %v2183_v37, %v2142_v38 }
 0x699   : > { %2217 = vrot.lane.b32.xlu0 %v2189_v28, %s4152_s14 }
 0x69e   : > { %v2186_v54 = vpop.f32.mrf.mxu3 }
 0x69f   : > { %v2190_v19 = vmul.f32 %v2186_v54, %v2143_v43 }
 0x6a1   : > { %2219 = vrot.lane.b32.xlu1 %v2190_v19, %s4152_s14  ;;  %s2907_s14 = scalar_lea.hbm %s4056_s11, 32 }
 0x6a2   : > { %p2909_p1 = scmp.lt.s32.totalorder %s2907_s14, %s2903_s29 }
 0x6a4   : > { %p2910_p2 = por %p2909_p1, %p2908_p0 }
 0x6a6   : > { %p2911_p3 = pnand %p2910_p2, %p2906_p13 }
 0x6d3   : > { %v2202_v29 = vpop.permute.xlu2 %2201 }
 0x6d4   : > { %v2225_v27 = vsel %vm1612_vm12, %v2223_v21, %v2202_v29 }
 0x6eb   : > { %v2212_v35 = vpop.permute.xlu2 %2211 }
 0x6f3   : > { %v2204_v7 = vpop.permute.xlu0 %2203 }
 0x6f4   : > { %v2226_v25 = vsel %vm1612_vm12, %v2224_v34, %v2204_v7 }
 0x6f5   : > { %v2228_v36 = vsel %vm1615_vm13, %v2226_v25, %v2212_v35 }
 0x6fb   : > { %v2210_v41 = vpop.permute.xlu1 %2209 }
 0x6fc   : > { %v2227_v59 = vsel %vm1615_vm13, %v2225_v27, %v2210_v41 }
 0x70b   : > { %v2218_v0 = vpop.permute.xlu0 %2217 }
 0x70c   : > { %v2229_v13 = vsel %vm679_vm2, %v2227_v59, %v2218_v0 }
 0x70d   : > { %v2235_v55 = vmul.f32 %v2813_v60, %v2229_v13 }
 0x70f   : > { %v2241_v62 = vadd.f32 %v2814_v2, %v2235_v55 }
 0x711   : > { %2243 = vst.msk [vmem:[%s380_s0] sm:$0xff] %vm1620_vm14, %v2241_v62 }
 0x713   : > { %v2220_v1 = vpop.permute.xlu1 %2219 }
 0x714   : > { %v2230_v42 = vsel %vm679_vm2, %v2228_v36, %v2220_v1 }
 0x715   : > { %v2236_v12 = vmul.f32 %v2813_v60, %v2230_v42 }
 0x717   : > { %v2242_v40 = vadd.f32 %v2814_v2, %v2236_v12 }
 0x719   : > { %2244 = vst.msk [vmem:[%s380_s0 + $0x8] sm:$0xff] %vm1620_vm14, %v2242_v40 }
 0x71a   : > { %2914 = shalt.err (!%p2911_p3)
}
 0x71b   : > { %s2965_s30 = smov 128  }
 0x71c   : > { %2441 = dma.vmem_to_hbm [thread:$0]  (%p3064_p5), %s2259_s15, 256, %s2261_s21, %s2246_s25, %s2965_s30, %s2965_s30, %s4149_s13  }
 0x71d PF: > { %p2447_p4 = scmp.ge.s32.totalorder %s2949_s20, 2  ;;  %s2275_s0 = sand.u32 1, %s2937_s17  }
 0x71e   : > { %s2276_s1 = scalar_lea.sflag [#allocation3], %s2275_s0 }
 0x71f   : > { %p2444_p7 = pnand %p2447_p4, %p3068_p6 }
 0x721   : > { %p2445_p8 = pneg %p2444_p7 }
 0x723   : > { %2932 = dma.done.wait (%p2445_p8), %s2276_s1, 256  }
 0x724   : > { %2934 = vsyncadd (%p2445_p8), %s2276_s1, 4294967040  ;;  %p21_p9 = scmp.ge.s32.totalorder %s3051_s23, 4   ;;  %s4153_s17 = smov %s2941_s18 }
 0x725   : > { %s4154_s18 = smov %s2945_s19  ;;  %s4155_s19 = smov %s3062_s26 }
 0x726   : > { %s4156_s20 = smov %s3051_s23  ;;  %23 = sbr.rel (!%p21_p9) target bundleno = 6 (0x6), region = 99 }
 0x72b   :  { %2282 = vsyncpa [#allocation3], 1 }
 0x72c   :  { %2284 = vsyncpa [#allocation3 + $0x1], 1 }

</bundles_post_ra>
